<compile_context>
chip_gen: v7x
topology: tpu7x:2x2x1
jax: 0.10.0
libtpu: 0.0.40
codegen_flags: <defaults>
</compile_context>

<pallas_src>
import functools

import jax
import jax.numpy as jnp
from jax.experimental import pallas as pl
from jax.experimental.pallas import tpu as pltpu

EPS = 1e-5


def _ru8(n):
    """Round up to a multiple of 8 (sublane tile)."""
    return (n + 7) // 8 * 8


def _instance_norm_cols(y):
    """InstanceNorm1d (affine=False): per-channel (column) stats over length (rows)."""
    mean = jnp.mean(y, axis=0, keepdims=True)
    var = jnp.mean((y - mean) ** 2, axis=0, keepdims=True)   # biased variance
    return (y - mean) * jax.lax.rsqrt(var + EPS)


def mlstm_fcn_kernel(
    # ---- inputs (one sample per grid step; weights are whole-array blocks) ----
    x_ref,                      # (S1, c_in) f32: zero-padded, channels-last sample
    w1_ref, b1_ref,             # (K1*c_in, n0) bf16, (1, n0) f32
    w2_ref, b2_ref,             # (K2*n0,  n1) bf16, (1, n1) f32
    w3_ref, b3_ref,             # (K3*n1,  n2) bf16, (1, n2) f32
    wds_ref, bds_ref,           # (n2, 2*n1) bf16, (1, 2*n1) f32   [att_data | att_softmax]
    wf1_ref, bf1_ref,           # (L3*n1, n2) bf16, (1, n2) f32    fc1 (pre-permuted)
    wf2_ref, bf2_ref,           # (n2, c_out) bf16, (1, c_out) f32
    alphas_ref,                 # (1, 3) f32: PReLU slopes
    # ---- output ----
    out_ref,                    # (1, c_out) f32
    # ---- VMEM scratch (fully re-initialized every grid step) ----
    s2_ref,                     # (S2, n0): zero-padded conv2 input
    s3_ref,                     # (S3, n1): zero-padded conv3 input
    u1_ref, u2_ref,             # pre-maxpool staging
    c1_ref, c2_ref, c3_ref,     # im2col staging (Lout, K*Cin)
    md_ref,                     # (1, L3*n1): flattened fc1 input
    *, L, c_in, nfs, kss, pads,
):
    n0, n1, n2 = nfs
    K1, K2, K3 = kss
    p1, p2, p3 = pads
    L1, L2, L3 = L, L // 2, L // 4
    a2, a3 = _ru8(p2), _ru8(p3)

    # PReLU slopes as (1,1) values; broadcast happens once per use (no per-b loop).
    a_pr1 = alphas_ref[0:1, 0:1]
    a_pr2 = alphas_ref[0:1, 1:2]
    a_pr3 = alphas_ref[0:1, 2:3]

    def conv_same(src_ref, lo, lout, cin, ktaps, cols_ref, w_ref, b_ref):
        """'Same' Conv1d for one sample as ONE matmul with contraction K*Cin.

        The K shifted taps are concatenated along the lane axis into an
        (lout, K*cin) im2col block, then contracted against the host-reshaped
        (K*cin, Cout) weight on the MXU (bf16 operands, f32 accumulation).
        """
        for kk in range(ktaps):                              # static unroll over taps
            cols_ref[0:lout, kk * cin:(kk + 1) * cin] = \
                src_ref[lo + kk:lo + kk + lout, :]
        cols = cols_ref[0:lout, :].astype(jnp.bfloat16)
        z = jnp.dot(cols, w_ref[...], preferred_element_type=jnp.float32)
        return z + b_ref[...]

    def norm_act(z, alpha):
        y = _instance_norm_cols(z)                           # f32 VPU math
        y = jnp.where(y > 0, y, alpha * y)                   # PReLU, shared slope
        # TODO(synk): nn.Dropout is an inference-time identity; nothing to emit.
        return y

    def max_pool2(u_ref, y, lout):
        """max_pool1d(kernel=2, stride=2) via two strided sublane reads."""
        u_ref[0:lout, :] = y
        even = u_ref[pl.ds(0, lout // 2, stride=2), :]
        odd = u_ref[pl.ds(1, lout // 2, stride=2), :]
        return jnp.maximum(even, odd)

    # ---------------- ConvBlock 1 + max_pool1d(2) ----------------
    z1 = conv_same(x_ref, 0, L1, c_in, K1, c1_ref, w1_ref, b1_ref)          # (L1, n0)
    y1 = max_pool2(u1_ref, norm_act(z1, a_pr1), L1)                         # (L2, n0)

    # Zero ONLY the pad rows of s2 (data goes in 8-row aligned at a2); the
    # alignment-slack tail is included in the second zero store.
    if a2 > 0:
        s2_ref[0:a2, :] = jnp.zeros((a2, n0), jnp.float32)
    if s2_ref.shape[0] - (a2 + L2) > 0:
        s2_ref[a2 + L2:s2_ref.shape[0], :] = jnp.zeros(
            (s2_ref.shape[0] - (a2 + L2), n0), jnp.float32)
    s2_ref[a2:a2 + L2, :] = y1

    # ---------------- ConvBlock 2 + max_pool1d(2) ----------------
    z2 = conv_same(s2_ref, a2 - p2, L2, n0, K2, c2_ref, w2_ref, b2_ref)     # (L2, n1)
    y2 = max_pool2(u2_ref, norm_act(z2, a_pr2), L2)                         # (L3, n1)

    if a3 > 0:
        s3_ref[0:a3, :] = jnp.zeros((a3, n1), jnp.float32)
    if s3_ref.shape[0] - (a3 + L3) > 0:
        s3_ref[a3 + L3:s3_ref.shape[0], :] = jnp.zeros(
            (s3_ref.shape[0] - (a3 + L3), n1), jnp.float32)
    s3_ref[a3:a3 + L3, :] = y2

    # ---------------- ConvBlock 3 (no pool) ----------------
    z3 = conv_same(s3_ref, a3 - p3, L3, n1, K3, c3_ref, w3_ref, b3_ref)     # (L3, n2)
    h = norm_act(z3, a_pr3)                                                 # (L3, n2)

    # -------- attention: both 1x1 convs fused into ONE matmul -> [A | S] --------
    asq = jnp.dot(h.astype(jnp.bfloat16), wds_ref[...],
                  preferred_element_type=jnp.float32) + bds_ref[...]        # (L3, 2*n1)
    att = asq[:, 0:n1]                                   # attention_data
    sft = asq[:, n1:2 * n1]                              # attention_softmax logits
    sft = sft - jnp.max(sft, axis=0, keepdims=True)      # softmax over the seq axis
    e = jnp.exp(sft)
    sm = e * pl.reciprocal(jnp.sum(e, axis=0, keepdims=True), approx=True)
    m = att * sm                                         # (L3, n1)

    # ------- fc1: pack m row-major (l, c) -> ONE big-contraction matmul --------
    for l in range(L3):                                  # static unroll (small L3)
        md_ref[0:1, l * n1:(l + 1) * n1] = m[l:l + 1, :]
    d = jnp.dot(md_ref[...].astype(jnp.bfloat16), wf1_ref[...],
                preferred_element_type=jnp.float32) + bf1_ref[...]           # (1, n2)

    # InstanceNorm1d on the 2-D fc1 output == per-row normalization (no affine).
    mu = jnp.mean(d, axis=1, keepdims=True)
    var = jnp.mean((d - mu) ** 2, axis=1, keepdims=True)
    dense = jax.nn.sigmoid((d - mu) * jax.lax.rsqrt(var + EPS))              # (1, n2)

    # ---------------- fc2 ----------------
    out = jnp.dot(dense.astype(jnp.bfloat16), wf2_ref[...],
                  preferred_element_type=jnp.float32) + bf2_ref[...]         # (1, c_out)
    out_ref[...] = out.astype(out_ref.dtype)


def mlstm_fcn_forward(x_ncw, params, kss, pads):
    """x_ncw: (B, c_in, L) PyTorch NCW input.  Returns (B, c_out) logits."""
    B, c_in, L = x_ncw.shape
    K1, K2, K3 = kss
    p1, p2, p3 = pads
    assert L % 4 == 0, "seq_len must be divisible by 4 (two max_pool1d(2) stages)"
    assert 2 * p1 == K1 - 1 and 2 * p2 == K2 - 1 and 2 * p3 == K3 - 1, \
        "kernel assumes 'same' convolutions: 2*pad == kernel_size - 1 per stage"

    n0 = params["conv1_w"].shape[0]
    n1 = params["conv2_w"].shape[0]
    n2 = params["conv3_w"].shape[0]
    c_out = params["fc2_w"].shape[0]
    L1, L2, L3 = L, L // 2, L // 4
    a2, a3 = _ru8(p2), _ru8(p3)
    S1 = _ru8(L1 + 2 * p1)
    S2 = _ru8(a2 + L2 + p2)
    S3 = _ru8(a3 + L3 + p3)

    # NCW -> channels-last (length on sublanes, channels on lanes) + zero pad the
    # length axis once for conv1.  The raw input is tiny relative to activations,
    # so this single host-side copy is accepted.
    x = jnp.transpose(x_ncw, (0, 2, 1)).astype(jnp.float32)                # (B, L, c_in)
    x = jnp.pad(x, ((0, 0), (p1, S1 - L - p1), (0, 0)))                    # (B, S1, c_in)

    def conv_w(w):
        # torch (Cout, Cin, K) -> (K*Cin, Cout): matches the lane-concatenated
        # im2col layout (tap-major, channel-minor).  bf16 for the MXU.
        cout, cin, k = w.shape
        return jnp.transpose(w, (2, 1, 0)).reshape(k * cin, cout).astype(jnp.bfloat16)

    w1 = conv_w(params["conv1_w"])
    b1 = params["conv1_b"].reshape(1, n0).astype(jnp.float32)
    w2 = conv_w(params["conv2_w"])
    b2 = params["conv2_b"].reshape(1, n1).astype(jnp.float32)
    w3 = conv_w(params["conv3_w"])
    b3 = params["conv3_b"].reshape(1, n2).astype(jnp.float32)

    # Both 1x1 attention convs fused into one (n2, 2*n1) weight -> [A | S].
    wd = jnp.transpose(params["attd_w"][:, :, 0], (1, 0))                  # (n2, n1)
    ws = jnp.transpose(params["atts_w"][:, :, 0], (1, 0))
    wds = jnp.concatenate([wd, ws], axis=1).astype(jnp.bfloat16)           # (n2, 2*n1)
    bds = jnp.concatenate([params["attd_b"], params["atts_b"]]
                          ).reshape(1, 2 * n1).astype(jnp.float32)

    # PyTorch flattens (B, n1, L3) channel-major (index c*L3 + l); the kernel
    # packs m row-major (index l*n1 + c), so permute fc1's input dim once here.
    wf1 = (jnp.transpose(params["fc1_w"].reshape(n2, n1, L3), (2, 1, 0))
           .reshape(L3 * n1, n2).astype(jnp.bfloat16))
    bf1 = params["fc1_b"].reshape(1, n2).astype(jnp.float32)
    wf2 = jnp.transpose(params["fc2_w"], (1, 0)).astype(jnp.bfloat16)      # (n2, c_out)
    bf2 = params["fc2_b"].reshape(1, c_out).astype(jnp.float32)
    alphas = jnp.stack([params["conv1_a"], params["conv2_a"],
                        params["conv3_a"]]).reshape(1, 3).astype(jnp.float32)

    kern = functools.partial(
        mlstm_fcn_kernel, L=L, c_in=c_in, nfs=(n0, n1, n2),
        kss=(K1, K2, K3), pads=(p1, p2, p3))

    def wspec(arr):
        # Whole-array (un-blocked) weight: same block for every grid step.
        return pl.BlockSpec(arr.shape, lambda b: (0, 0))

    weights = (w1, b1, w2, b2, w3, b3, wds, bds, wf1, bf1, wf2, bf2, alphas)
    in_specs = ([pl.BlockSpec((None, S1, c_in), lambda b: (b, 0, 0))]
                + [wspec(w) for w in weights])
    out_specs = pl.BlockSpec((None, 1, c_out), lambda b: (b, 0, 0))

    scratch_shapes = [
        pltpu.VMEM((S2, n0), jnp.float32),                 # padded conv2 input
        pltpu.VMEM((S3, n1), jnp.float32),                 # padded conv3 input
        pltpu.VMEM((_ru8(L1), n0), jnp.float32),           # pre-maxpool staging 1
        pltpu.VMEM((_ru8(L2), n1), jnp.float32),           # pre-maxpool staging 2
        pltpu.VMEM((_ru8(L1), K1 * c_in), jnp.float32),    # im2col conv1
        pltpu.VMEM((_ru8(L2), K2 * n0), jnp.float32),      # im2col conv2
        pltpu.VMEM((_ru8(L3), K3 * n1), jnp.float32),      # im2col conv3
        pltpu.VMEM((1, L3 * n1), jnp.float32),             # flattened fc1 input
    ]

    # Size the scoped-VMEM limit to actual usage (defaults are 16/32 MiB), but
    # stay within v7x's 64 MiB per-core budget.
    weight_bytes = sum(int(w.size) * w.dtype.itemsize for w in weights)
    scratch_bytes = 4 * (S2 * n0 + S3 * n1 + _ru8(L1) * n0 + _ru8(L2) * n1
                         + _ru8(L1) * K1 * c_in + _ru8(L2) * K2 * n0
                         + _ru8(L3) * K3 * n1 + L3 * n1)
    block_bytes = 2 * (S1 * c_in * 4 + c_out * 4)          # double-buffered per-step I/O
    vmem_limit = int(min(64 * 1024 * 1024,
                         max(8 * 1024 * 1024,
                             4 * (weight_bytes + scratch_bytes + block_bytes))))

    out = pl.pallas_call(
        kern,
        grid=(B,),                                         # one sample per grid step
        in_specs=in_specs,
        out_specs=out_specs,
        out_shape=jax.ShapeDtypeStruct((B, 1, c_out), jnp.float32),
        scratch_shapes=scratch_shapes,
        compiler_params=pltpu.CompilerParams(
            dimension_semantics=("parallel",),             # megacore split on v7x
            vmem_limit_bytes=vmem_limit),
    )(x, *weights)
    return out.reshape(B, c_out)


def init_params(key, c_in, c_out, seq_len, nfs, kss):
    ks = jax.random.split(key, 12)
    scale = 0.05
    n0, n1, n2 = nfs
    return {
        "conv1_w": jax.random.normal(ks[0], (n0, c_in, kss[0]), jnp.float32) * scale,
        "conv1_b": jax.random.normal(ks[1], (n0,), jnp.float32) * scale,
        "conv1_a": jnp.float32(0.25),
        "conv2_w": jax.random.normal(ks[2], (n1, n0, kss[1]), jnp.float32) * scale,
        "conv2_b": jax.random.normal(ks[3], (n1,), jnp.float32) * scale,
        "conv2_a": jnp.float32(0.25),
        "conv3_w": jax.random.normal(ks[4], (n2, n1, kss[2]), jnp.float32) * scale,
        "conv3_b": jax.random.normal(ks[5], (n2,), jnp.float32) * scale,
        "conv3_a": jnp.float32(0.25),
        "attd_w": jax.random.normal(ks[6], (n1, n2, 1), jnp.float32) * scale,
        "attd_b": jax.random.normal(ks[7], (n1,), jnp.float32) * scale,
        "atts_w": jax.random.normal(ks[8], (n1, n2, 1), jnp.float32) * scale,
        "atts_b": jax.random.normal(ks[9], (n1,), jnp.float32) * scale,
        "fc1_w": jax.random.normal(ks[10], (n2, n1 * seq_len // 4), jnp.float32) * scale,
        "fc1_b": jnp.zeros((n2,), jnp.float32),
        "fc2_w": jax.random.normal(ks[11], (c_out, n2), jnp.float32) * scale,
        "fc2_b": jnp.zeros((c_out,), jnp.float32),
    }


if __name__ == "__main__":
    # Small, module-consistent shapes (default kss/pads of MLSTM_FCN).
    B, c_in, c_out, seq_len = 2, 4, 3, 16
    nfs = [16, 32, 64]
    kss = [5, 11, 21]
    pads = [2, 5, 10]

    key = jax.random.PRNGKey(0)
    k_x, k_p = jax.random.split(key)
    x = jax.random.normal(k_x, (B, c_in, seq_len), jnp.float32)  # PyTorch NCW input
    params = init_params(k_p, c_in, c_out, seq_len, nfs, kss)

    fwd = jax.jit(functools.partial(mlstm_fcn_forward, kss=tuple(kss), pads=tuple(pads)))
    out = jax.block_until_ready(fwd(x, params))
    assert out.shape == (B, c_out), out.shape
    print("KERNEL_OK")
</pallas_src>

<mosaic_0001>
module attributes {stable_mosaic.version = 11 : i64} {
  func.func @mlstm_fcn_kernel(%arg0: i32, %arg1: memref<1x24x4xf32, #tpu.memory_space<vmem>>, %arg2: memref<20x16xbf16, #tpu.memory_space<vmem>>, %arg3: memref<1x16xf32, #tpu.memory_space<vmem>>, %arg4: memref<176x32xbf16, #tpu.memory_space<vmem>>, %arg5: memref<1x32xf32, #tpu.memory_space<vmem>>, %arg6: memref<672x64xbf16, #tpu.memory_space<vmem>>, %arg7: memref<1x64xf32, #tpu.memory_space<vmem>>, %arg8: memref<64x64xbf16, #tpu.memory_space<vmem>>, %arg9: memref<1x64xf32, #tpu.memory_space<vmem>>, %arg10: memref<128x64xbf16, #tpu.memory_space<vmem>>, %arg11: memref<1x64xf32, #tpu.memory_space<vmem>>, %arg12: memref<64x3xbf16, #tpu.memory_space<vmem>>, %arg13: memref<1x3xf32, #tpu.memory_space<vmem>>, %arg14: memref<1x3xf32, #tpu.memory_space<vmem>>, %arg15: memref<1x1x3xf32, #tpu.memory_space<vmem>>, %arg16: memref<24x16xf32, #tpu.memory_space<vmem>>, %arg17: memref<32x32xf32, #tpu.memory_space<vmem>>, %arg18: memref<16x16xf32, #tpu.memory_space<vmem>>, %arg19: memref<8x32xf32, #tpu.memory_space<vmem>>, %arg20: memref<16x20xf32, #tpu.memory_space<vmem>>, %arg21: memref<8x176xf32, #tpu.memory_space<vmem>>, %arg22: memref<8x672xf32, #tpu.memory_space<vmem>>, %arg23: memref<1x128xf32, #tpu.memory_space<vmem>>) attributes {dimension_semantics = [#tpu.dimension_semantics<parallel>], iteration_bounds = array<i64: 2>, scalar_prefetch = 0 : i64, scratch_operands = 8 : i64, tpu.core_type = #tpu.core_type<tc>, window_params = [{transform_indices = @transform_0, window_bounds = array<i64: 1, 24, 4>}, {pipeline_mode = #tpu.pipeline_mode<synchronous>, transform_indices = @transform_1, window_bounds = array<i64: 20, 16>}, {pipeline_mode = #tpu.pipeline_mode<synchronous>, transform_indices = @transform_2, window_bounds = array<i64: 1, 16>}, {pipeline_mode = #tpu.pipeline_mode<synchronous>, transform_indices = @transform_3, window_bounds = array<i64: 176, 32>}, {pipeline_mode = #tpu.pipeline_mode<synchronous>, transform_indices = @transform_4, window_bounds = array<i64: 1, 32>}, {pipeline_mode = #tpu.pipeline_mode<synchronous>, transform_indices = @transform_5, window_bounds = array<i64: 672, 64>}, {pipeline_mode = #tpu.pipeline_mode<synchronous>, transform_indices = @transform_6, window_bounds = array<i64: 1, 64>}, {pipeline_mode = #tpu.pipeline_mode<synchronous>, transform_indices = @transform_7, window_bounds = array<i64: 64, 64>}, {pipeline_mode = #tpu.pipeline_mode<synchronous>, transform_indices = @transform_8, window_bounds = array<i64: 1, 64>}, {pipeline_mode = #tpu.pipeline_mode<synchronous>, transform_indices = @transform_9, window_bounds = array<i64: 128, 64>}, {pipeline_mode = #tpu.pipeline_mode<synchronous>, transform_indices = @transform_10, window_bounds = array<i64: 1, 64>}, {pipeline_mode = #tpu.pipeline_mode<synchronous>, transform_indices = @transform_11, window_bounds = array<i64: 64, 3>}, {pipeline_mode = #tpu.pipeline_mode<synchronous>, transform_indices = @transform_12, window_bounds = array<i64: 1, 3>}, {pipeline_mode = #tpu.pipeline_mode<synchronous>, transform_indices = @transform_13, window_bounds = array<i64: 1, 3>}, {transform_indices = @transform_14, window_bounds = array<i64: 1, 1, 3>}]} {
    %c0 = arith.constant 0 : index
    %c0_0 = arith.constant 0 : index
    %0 = vector.load %arg14[%c0, %c0_0] : memref<1x3xf32, #tpu.memory_space<vmem>>, vector<1x1xf32>
    %c0_1 = arith.constant 0 : index
    %c1 = arith.constant 1 : index
    %1 = vector.load %arg14[%c0_1, %c1] : memref<1x3xf32, #tpu.memory_space<vmem>>, vector<1x1xf32>
    %c0_2 = arith.constant 0 : index
    %c2 = arith.constant 2 : index
    %2 = vector.load %arg14[%c0_2, %c2] : memref<1x3xf32, #tpu.memory_space<vmem>>, vector<1x1xf32>
    %c0_3 = arith.constant 0 : index
    %c0_4 = arith.constant 0 : index
    %c0_5 = arith.constant 0 : index
    %3 = vector.load %arg1[%c0_3, %c0_4, %c0_5] : memref<1x24x4xf32, #tpu.memory_space<vmem>>, vector<1x16x4xf32>
    %4 = vector.shape_cast %3 : vector<1x16x4xf32> to vector<16x4xf32>
    %c0_6 = arith.constant 0 : index
    %c0_7 = arith.constant 0 : index
    %5 = vector.load %arg20[%c0_6, %c0_7] : memref<16x20xf32, #tpu.memory_space<vmem>>, vector<16x4xf32>
    tpu.vector_store %arg20[%c0_6, %c0_7], %4 {strides = array<i32>} : memref<16x20xf32, #tpu.memory_space<vmem>>, vector<16x4xf32>,
    %c0_8 = arith.constant 0 : index
    %c1_9 = arith.constant 1 : index
    %c0_10 = arith.constant 0 : index
    %6 = vector.load %arg1[%c0_8, %c1_9, %c0_10] : memref<1x24x4xf32, #tpu.memory_space<vmem>>, vector<1x16x4xf32>
    %7 = vector.shape_cast %6 : vector<1x16x4xf32> to vector<16x4xf32>
    %c0_11 = arith.constant 0 : index
    %c4 = arith.constant 4 : index
    %8 = vector.load %arg20[%c0_11, %c4] : memref<16x20xf32, #tpu.memory_space<vmem>>, vector<16x4xf32>
    tpu.vector_store %arg20[%c0_11, %c4], %7 {strides = array<i32>} : memref<16x20xf32, #tpu.memory_space<vmem>>, vector<16x4xf32>,
    %c0_12 = arith.constant 0 : index
    %c2_13 = arith.constant 2 : index
    %c0_14 = arith.constant 0 : index
    %9 = vector.load %arg1[%c0_12, %c2_13, %c0_14] : memref<1x24x4xf32, #tpu.memory_space<vmem>>, vector<1x16x4xf32>
    %10 = vector.shape_cast %9 : vector<1x16x4xf32> to vector<16x4xf32>
    %c0_15 = arith.constant 0 : index
    %c8 = arith.constant 8 : index
    %11 = vector.load %arg20[%c0_15, %c8] : memref<16x20xf32, #tpu.memory_space<vmem>>, vector<16x4xf32>
    tpu.vector_store %arg20[%c0_15, %c8], %10 {strides = array<i32>} : memref<16x20xf32, #tpu.memory_space<vmem>>, vector<16x4xf32>,
    %c0_16 = arith.constant 0 : index
    %c3 = arith.constant 3 : index
    %c0_17 = arith.constant 0 : index
    %12 = vector.load %arg1[%c0_16, %c3, %c0_17] : memref<1x24x4xf32, #tpu.memory_space<vmem>>, vector<1x16x4xf32>
    %13 = vector.shape_cast %12 : vector<1x16x4xf32> to vector<16x4xf32>
    %c0_18 = arith.constant 0 : index
    %c12 = arith.constant 12 : index
    %14 = vector.load %arg20[%c0_18, %c12] : memref<16x20xf32, #tpu.memory_space<vmem>>, vector<16x4xf32>
    tpu.vector_store %arg20[%c0_18, %c12], %13 {strides = array<i32>} : memref<16x20xf32, #tpu.memory_space<vmem>>, vector<16x4xf32>,
    %c0_19 = arith.constant 0 : index
    %c4_20 = arith.constant 4 : index
    %c0_21 = arith.constant 0 : index
    %15 = vector.load %arg1[%c0_19, %c4_20, %c0_21] : memref<1x24x4xf32, #tpu.memory_space<vmem>>, vector<1x16x4xf32>
    %16 = vector.shape_cast %15 : vector<1x16x4xf32> to vector<16x4xf32>
    %c0_22 = arith.constant 0 : index
    %c16 = arith.constant 16 : index
    %17 = vector.load %arg20[%c0_22, %c16] : memref<16x20xf32, #tpu.memory_space<vmem>>, vector<16x4xf32>
    tpu.vector_store %arg20[%c0_22, %c16], %16 {strides = array<i32>} : memref<16x20xf32, #tpu.memory_space<vmem>>, vector<16x4xf32>,
    %c0_23 = arith.constant 0 : index
    %c0_24 = arith.constant 0 : index
    %18 = vector.load %arg20[%c0_23, %c0_24] : memref<16x20xf32, #tpu.memory_space<vmem>>, vector<16x20xf32>
    %19 = arith.truncf %18 : vector<16x20xf32> to vector<16x20xbf16>
    %c0_25 = arith.constant 0 : index
    %c0_26 = arith.constant 0 : index
    %20 = vector.load %arg2[%c0_25, %c0_26] : memref<20x16xbf16, #tpu.memory_space<vmem>>, vector<20x16xbf16>
    %cst = arith.constant dense<0.000000e+00> : vector<16x16xf32>
    %21 = tpu.matmul %19, %20, %cst {dimension_numbers = #tpu.dot_dimension_numbers<[1], [0], [0], [1], [0, 0, 1, 1], [], []>} : vector<16x20xbf16>, vector<20x16xbf16>, vector<16x16xf32> -> vector<16x16xf32>
    %c0_27 = arith.constant 0 : index
    %c0_28 = arith.constant 0 : index
    %22 = vector.load %arg3[%c0_27, %c0_28] : memref<1x16xf32, #tpu.memory_space<vmem>>, vector<1x16xf32>
    %23 = vector.broadcast %22 : vector<1x16xf32> to vector<16x16xf32>
    %24 = arith.addf %21, %23 : vector<16x16xf32>
    %cst_29 = arith.constant dense<0.000000e+00> : vector<16xf32>
    %25 = vector.multi_reduction <add>, %24, %cst_29 [0] : vector<16x16xf32> to vector<16xf32>
    %26 = vector.shape_cast %25 : vector<16xf32> to vector<1x16xf32>
    %cst_30 = arith.constant 1.600000e+01 : f32
    %27 = vector.broadcast %cst_30 : f32 to vector<1x16xf32>
    %28 = arith.divf %26, %27 : vector<1x16xf32>
    %29 = vector.broadcast %28 : vector<1x16xf32> to vector<16x16xf32>
    %30 = arith.subf %24, %29 : vector<16x16xf32>
    %31 = arith.mulf %30, %30 : vector<16x16xf32>
    %cst_31 = arith.constant dense<0.000000e+00> : vector<16xf32>
    %32 = vector.multi_reduction <add>, %31, %cst_31 [0] : vector<16x16xf32> to vector<16xf32>
    %33 = vector.shape_cast %32 : vector<16xf32> to vector<1x16xf32>
    %cst_32 = arith.constant 1.600000e+01 : f32
    %34 = vector.broadcast %cst_32 : f32 to vector<1x16xf32>
    %35 = arith.divf %33, %34 : vector<1x16xf32>
    %36 = vector.broadcast %28 : vector<1x16xf32> to vector<16x16xf32>
    %37 = arith.subf %24, %36 : vector<16x16xf32>
    %cst_33 = arith.constant 9.99999974E-6 : f32
    %38 = vector.broadcast %cst_33 : f32 to vector<1x16xf32>
    %39 = arith.addf %35, %38 : vector<1x16xf32>
    %40 = math.rsqrt %39 : vector<1x16xf32>
    %41 = vector.broadcast %40 : vector<1x16xf32> to vector<16x16xf32>
    %42 = arith.mulf %37, %41 : vector<16x16xf32>
    %cst_34 = arith.constant 0.000000e+00 : f32
    %43 = vector.broadcast %cst_34 : f32 to vector<16x16xf32>
    %44 = arith.cmpf ogt, %42, %43 : vector<16x16xf32>
    %45 = vector.broadcast %0 : vector<1x1xf32> to vector<16x16xf32>
    %46 = arith.mulf %45, %42 : vector<16x16xf32>
    %47 = arith.select %44, %42, %46 : vector<16x16xi1>, vector<16x16xf32>
    %c0_35 = arith.constant 0 : index
    %c0_36 = arith.constant 0 : index
    %48 = vector.load %arg18[%c0_35, %c0_36] : memref<16x16xf32, #tpu.memory_space<vmem>>, vector<16x16xf32>
    tpu.vector_store %arg18[%c0_35, %c0_36], %47 {strides = array<i32>} : memref<16x16xf32, #tpu.memory_space<vmem>>, vector<16x16xf32>,
    %c0_37 = arith.constant 0 : index
    %c0_38 = arith.constant 0 : index
    %49 = tpu.strided_load %arg18[%c0_37, %c0_38] {strides = array<i32: 2, 1>} : memref<16x16xf32, #tpu.memory_space<vmem>>, vector<8x16xf32>
    %c1_39 = arith.constant 1 : index
    %c0_40 = arith.constant 0 : index
    %50 = tpu.strided_load %arg18[%c1_39, %c0_40] {strides = array<i32: 2, 1>} : memref<16x16xf32, #tpu.memory_space<vmem>>, vector<8x16xf32>
    %51 = arith.maximumf %49, %50 : vector<8x16xf32>
    %cst_41 = arith.constant 0.000000e+00 : f32
    %52 = vector.broadcast %cst_41 : f32 to vector<8x16xf32>
    %c0_42 = arith.constant 0 : index
    %c0_43 = arith.constant 0 : index
    %53 = vector.load %arg16[%c0_42, %c0_43] : memref<24x16xf32, #tpu.memory_space<vmem>>, vector<8x16xf32>
    tpu.vector_store %arg16[%c0_42, %c0_43], %52 {strides = array<i32>} : memref<24x16xf32, #tpu.memory_space<vmem>>, vector<8x16xf32>,
    %cst_44 = arith.constant 0.000000e+00 : f32
    %54 = vector.broadcast %cst_44 : f32 to vector<8x16xf32>
    %c16_45 = arith.constant 16 : index
    %c0_46 = arith.constant 0 : index
    %55 = vector.load %arg16[%c16_45, %c0_46] : memref<24x16xf32, #tpu.memory_space<vmem>>, vector<8x16xf32>
    tpu.vector_store %arg16[%c16_45, %c0_46], %54 {strides = array<i32>} : memref<24x16xf32, #tpu.memory_space<vmem>>, vector<8x16xf32>,
    %c8_47 = arith.constant 8 : index
    %c0_48 = arith.constant 0 : index
    %56 = vector.load %arg16[%c8_47, %c0_48] : memref<24x16xf32, #tpu.memory_space<vmem>>, vector<8x16xf32>
    tpu.vector_store %arg16[%c8_47, %c0_48], %51 {strides = array<i32>} : memref<24x16xf32, #tpu.memory_space<vmem>>, vector<8x16xf32>,
    %c3_49 = arith.constant 3 : index
    %c0_50 = arith.constant 0 : index
    %57 = vector.load %arg16[%c3_49, %c0_50] : memref<24x16xf32, #tpu.memory_space<vmem>>, vector<8x16xf32>
    %c0_51 = arith.constant 0 : index
    %c0_52 = arith.constant 0 : index
    %58 = vector.load %arg21[%c0_51, %c0_52] : memref<8x176xf32, #tpu.memory_space<vmem>>, vector<8x16xf32>
    tpu.vector_store %arg21[%c0_51, %c0_52], %57 {strides = array<i32>} : memref<8x176xf32, #tpu.memory_space<vmem>>, vector<8x16xf32>,
    %c4_53 = arith.constant 4 : index
    %c0_54 = arith.constant 0 : index
    %59 = vector.load %arg16[%c4_53, %c0_54] : memref<24x16xf32, #tpu.memory_space<vmem>>, vector<8x16xf32>
    %c0_55 = arith.constant 0 : index
    %c16_56 = arith.constant 16 : index
    %60 = vector.load %arg21[%c0_55, %c16_56] : memref<8x176xf32, #tpu.memory_space<vmem>>, vector<8x16xf32>
    tpu.vector_store %arg21[%c0_55, %c16_56], %59 {strides = array<i32>} : memref<8x176xf32, #tpu.memory_space<vmem>>, vector<8x16xf32>,
    %c5 = arith.constant 5 : index
    %c0_57 = arith.constant 0 : index
    %61 = vector.load %arg16[%c5, %c0_57] : memref<24x16xf32, #tpu.memory_space<vmem>>, vector<8x16xf32>
    %c0_58 = arith.constant 0 : index
    %c32 = arith.constant 32 : index
    %62 = vector.load %arg21[%c0_58, %c32] : memref<8x176xf32, #tpu.memory_space<vmem>>, vector<8x16xf32>
    tpu.vector_store %arg21[%c0_58, %c32], %61 {strides = array<i32>} : memref<8x176xf32, #tpu.memory_space<vmem>>, vector<8x16xf32>,
    %c6 = arith.constant 6 : index
    %c0_59 = arith.constant 0 : index
    %63 = vector.load %arg16[%c6, %c0_59] : memref<24x16xf32, #tpu.memory_space<vmem>>, vector<8x16xf32>
    %c0_60 = arith.constant 0 : index
    %c48 = arith.constant 48 : index
    %64 = vector.load %arg21[%c0_60, %c48] : memref<8x176xf32, #tpu.memory_space<vmem>>, vector<8x16xf32>
    tpu.vector_store %arg21[%c0_60, %c48], %63 {strides = array<i32>} : memref<8x176xf32, #tpu.memory_space<vmem>>, vector<8x16xf32>,
    %c7 = arith.constant 7 : index
    %c0_61 = arith.constant 0 : index
    %65 = vector.load %arg16[%c7, %c0_61] : memref<24x16xf32, #tpu.memory_space<vmem>>, vector<8x16xf32>
    %c0_62 = arith.constant 0 : index
    %c64 = arith.constant 64 : index
    %66 = vector.load %arg21[%c0_62, %c64] : memref<8x176xf32, #tpu.memory_space<vmem>>, vector<8x16xf32>
    tpu.vector_store %arg21[%c0_62, %c64], %65 {strides = array<i32>} : memref<8x176xf32, #tpu.memory_space<vmem>>, vector<8x16xf32>,
    %c8_63 = arith.constant 8 : index
    %c0_64 = arith.constant 0 : index
    %67 = vector.load %arg16[%c8_63, %c0_64] : memref<24x16xf32, #tpu.memory_space<vmem>>, vector<8x16xf32>
    %c0_65 = arith.constant 0 : index
    %c80 = arith.constant 80 : index
    %68 = vector.load %arg21[%c0_65, %c80] : memref<8x176xf32, #tpu.memory_space<vmem>>, vector<8x16xf32>
    tpu.vector_store %arg21[%c0_65, %c80], %67 {strides = array<i32>} : memref<8x176xf32, #tpu.memory_space<vmem>>, vector<8x16xf32>,
    %c9 = arith.constant 9 : index
    %c0_66 = arith.constant 0 : index
    %69 = vector.load %arg16[%c9, %c0_66] : memref<24x16xf32, #tpu.memory_space<vmem>>, vector<8x16xf32>
    %c0_67 = arith.constant 0 : index
    %c96 = arith.constant 96 : index
    %70 = vector.load %arg21[%c0_67, %c96] : memref<8x176xf32, #tpu.memory_space<vmem>>, vector<8x16xf32>
    tpu.vector_store %arg21[%c0_67, %c96], %69 {strides = array<i32>} : memref<8x176xf32, #tpu.memory_space<vmem>>, vector<8x16xf32>,
    %c10 = arith.constant 10 : index
    %c0_68 = arith.constant 0 : index
    %71 = vector.load %arg16[%c10, %c0_68] : memref<24x16xf32, #tpu.memory_space<vmem>>, vector<8x16xf32>
    %c0_69 = arith.constant 0 : index
    %c112 = arith.constant 112 : index
    %72 = vector.load %arg21[%c0_69, %c112] : memref<8x176xf32, #tpu.memory_space<vmem>>, vector<8x16xf32>
    tpu.vector_store %arg21[%c0_69, %c112], %71 {strides = array<i32>} : memref<8x176xf32, #tpu.memory_space<vmem>>, vector<8x16xf32>,
    %c11 = arith.constant 11 : index
    %c0_70 = arith.constant 0 : index
    %73 = vector.load %arg16[%c11, %c0_70] : memref<24x16xf32, #tpu.memory_space<vmem>>, vector<8x16xf32>
    %c0_71 = arith.constant 0 : index
    %c128 = arith.constant 128 : index
    %74 = vector.load %arg21[%c0_71, %c128] : memref<8x176xf32, #tpu.memory_space<vmem>>, vector<8x16xf32>
    tpu.vector_store %arg21[%c0_71, %c128], %73 {strides = array<i32>} : memref<8x176xf32, #tpu.memory_space<vmem>>, vector<8x16xf32>,
    %c12_72 = arith.constant 12 : index
    %c0_73 = arith.constant 0 : index
    %75 = vector.load %arg16[%c12_72, %c0_73] : memref<24x16xf32, #tpu.memory_space<vmem>>, vector<8x16xf32>
    %c0_74 = arith.constant 0 : index
    %c144 = arith.constant 144 : index
    %76 = vector.load %arg21[%c0_74, %c144] : memref<8x176xf32, #tpu.memory_space<vmem>>, vector<8x16xf32>
    tpu.vector_store %arg21[%c0_74, %c144], %75 {strides = array<i32>} : memref<8x176xf32, #tpu.memory_space<vmem>>, vector<8x16xf32>,
    %c13 = arith.constant 13 : index
    %c0_75 = arith.constant 0 : index
    %77 = vector.load %arg16[%c13, %c0_75] : memref<24x16xf32, #tpu.memory_space<vmem>>, vector<8x16xf32>
    %c0_76 = arith.constant 0 : index
    %c160 = arith.constant 160 : index
    %78 = vector.load %arg21[%c0_76, %c160] : memref<8x176xf32, #tpu.memory_space<vmem>>, vector<8x16xf32>
    tpu.vector_store %arg21[%c0_76, %c160], %77 {strides = array<i32>} : memref<8x176xf32, #tpu.memory_space<vmem>>, vector<8x16xf32>,
    %c0_77 = arith.constant 0 : index
    %c0_78 = arith.constant 0 : index
    %79 = vector.load %arg21[%c0_77, %c0_78] : memref<8x176xf32, #tpu.memory_space<vmem>>, vector<8x176xf32>
    %80 = arith.truncf %79 : vector<8x176xf32> to vector<8x176xbf16>
    %c0_79 = arith.constant 0 : index
    %c0_80 = arith.constant 0 : index
    %81 = vector.load %arg4[%c0_79, %c0_80] : memref<176x32xbf16, #tpu.memory_space<vmem>>, vector<176x32xbf16>
    %cst_81 = arith.constant dense<0.000000e+00> : vector<8x32xf32>
    %82 = tpu.matmul %80, %81, %cst_81 {dimension_numbers = #tpu.dot_dimension_numbers<[1], [0], [0], [1], [0, 0, 1, 1], [], []>} : vector<8x176xbf16>, vector<176x32xbf16>, vector<8x32xf32> -> vector<8x32xf32>
    %c0_82 = arith.constant 0 : index
    %c0_83 = arith.constant 0 : index
    %83 = vector.load %arg5[%c0_82, %c0_83] : memref<1x32xf32, #tpu.memory_space<vmem>>, vector<1x32xf32>
    %84 = vector.broadcast %83 : vector<1x32xf32> to vector<8x32xf32>
    %85 = arith.addf %82, %84 : vector<8x32xf32>
    %cst_84 = arith.constant dense<0.000000e+00> : vector<32xf32>
    %86 = vector.multi_reduction <add>, %85, %cst_84 [0] : vector<8x32xf32> to vector<32xf32>
    %87 = vector.shape_cast %86 : vector<32xf32> to vector<1x32xf32>
    %cst_85 = arith.constant 8.000000e+00 : f32
    %88 = vector.broadcast %cst_85 : f32 to vector<1x32xf32>
    %89 = arith.divf %87, %88 : vector<1x32xf32>
    %90 = vector.broadcast %89 : vector<1x32xf32> to vector<8x32xf32>
    %91 = arith.subf %85, %90 : vector<8x32xf32>
    %92 = arith.mulf %91, %91 : vector<8x32xf32>
    %cst_86 = arith.constant dense<0.000000e+00> : vector<32xf32>
    %93 = vector.multi_reduction <add>, %92, %cst_86 [0] : vector<8x32xf32> to vector<32xf32>
    %94 = vector.shape_cast %93 : vector<32xf32> to vector<1x32xf32>
    %cst_87 = arith.constant 8.000000e+00 : f32
    %95 = vector.broadcast %cst_87 : f32 to vector<1x32xf32>
    %96 = arith.divf %94, %95 : vector<1x32xf32>
    %97 = vector.broadcast %89 : vector<1x32xf32> to vector<8x32xf32>
    %98 = arith.subf %85, %97 : vector<8x32xf32>
    %cst_88 = arith.constant 9.99999974E-6 : f32
    %99 = vector.broadcast %cst_88 : f32 to vector<1x32xf32>
    %100 = arith.addf %96, %99 : vector<1x32xf32>
    %101 = math.rsqrt %100 : vector<1x32xf32>
    %102 = vector.broadcast %101 : vector<1x32xf32> to vector<8x32xf32>
    %103 = arith.mulf %98, %102 : vector<8x32xf32>
    %cst_89 = arith.constant 0.000000e+00 : f32
    %104 = vector.broadcast %cst_89 : f32 to vector<8x32xf32>
    %105 = arith.cmpf ogt, %103, %104 : vector<8x32xf32>
    %106 = vector.broadcast %1 : vector<1x1xf32> to vector<8x32xf32>
    %107 = arith.mulf %106, %103 : vector<8x32xf32>
    %108 = arith.select %105, %103, %107 : vector<8x32xi1>, vector<8x32xf32>
    %c0_90 = arith.constant 0 : index
    %c0_91 = arith.constant 0 : index
    %109 = vector.load %arg19[%c0_90, %c0_91] : memref<8x32xf32, #tpu.memory_space<vmem>>, vector<8x32xf32>
    tpu.vector_store %arg19[%c0_90, %c0_91], %108 {strides = array<i32>} : memref<8x32xf32, #tpu.memory_space<vmem>>, vector<8x32xf32>,
    %c0_92 = arith.constant 0 : index
    %c0_93 = arith.constant 0 : index
    %110 = tpu.strided_load %arg19[%c0_92, %c0_93] {strides = array<i32: 2, 1>} : memref<8x32xf32, #tpu.memory_space<vmem>>, vector<4x32xf32>
    %c1_94 = arith.constant 1 : index
    %c0_95 = arith.constant 0 : index
    %111 = tpu.strided_load %arg19[%c1_94, %c0_95] {strides = array<i32: 2, 1>} : memref<8x32xf32, #tpu.memory_space<vmem>>, vector<4x32xf32>
    %112 = arith.maximumf %110, %111 : vector<4x32xf32>
    %cst_96 = arith.constant 0.000000e+00 : f32
    %113 = vector.broadcast %cst_96 : f32 to vector<16x32xf32>
    %c0_97 = arith.constant 0 : index
    %c0_98 = arith.constant 0 : index
    %114 = vector.load %arg17[%c0_97, %c0_98] : memref<32x32xf32, #tpu.memory_space<vmem>>, vector<16x32xf32>
    tpu.vector_store %arg17[%c0_97, %c0_98], %113 {strides = array<i32>} : memref<32x32xf32, #tpu.memory_space<vmem>>, vector<16x32xf32>,
    %cst_99 = arith.constant 0.000000e+00 : f32
    %115 = vector.broadcast %cst_99 : f32 to vector<12x32xf32>
    %c20 = arith.constant 20 : index
    %c0_100 = arith.constant 0 : index
    %116 = vector.load %arg17[%c20, %c0_100] : memref<32x32xf32, #tpu.memory_space<vmem>>, vector<12x32xf32>
    tpu.vector_store %arg17[%c20, %c0_100], %115 {strides = array<i32>} : memref<32x32xf32, #tpu.memory_space<vmem>>, vector<12x32xf32>,
    %c16_101 = arith.constant 16 : index
    %c0_102 = arith.constant 0 : index
    %117 = vector.load %arg17[%c16_101, %c0_102] : memref<32x32xf32, #tpu.memory_space<vmem>>, vector<4x32xf32>
    tpu.vector_store %arg17[%c16_101, %c0_102], %112 {strides = array<i32>} : memref<32x32xf32, #tpu.memory_space<vmem>>, vector<4x32xf32>,
    %c6_103 = arith.constant 6 : index
    %c0_104 = arith.constant 0 : index
    %118 = vector.load %arg17[%c6_103, %c0_104] : memref<32x32xf32, #tpu.memory_space<vmem>>, vector<4x32xf32>
    %c0_105 = arith.constant 0 : index
    %c0_106 = arith.constant 0 : index
    %119 = vector.load %arg22[%c0_105, %c0_106] : memref<8x672xf32, #tpu.memory_space<vmem>>, vector<4x32xf32>
    tpu.vector_store %arg22[%c0_105, %c0_106], %118 {strides = array<i32>} : memref<8x672xf32, #tpu.memory_space<vmem>>, vector<4x32xf32>,
    %c7_107 = arith.constant 7 : index
    %c0_108 = arith.constant 0 : index
    %120 = vector.load %arg17[%c7_107, %c0_108] : memref<32x32xf32, #tpu.memory_space<vmem>>, vector<4x32xf32>
    %c0_109 = arith.constant 0 : index
    %c32_110 = arith.constant 32 : index
    %121 = vector.load %arg22[%c0_109, %c32_110] : memref<8x672xf32, #tpu.memory_space<vmem>>, vector<4x32xf32>
    tpu.vector_store %arg22[%c0_109, %c32_110], %120 {strides = array<i32>} : memref<8x672xf32, #tpu.memory_space<vmem>>, vector<4x32xf32>,
    %c8_111 = arith.constant 8 : index
    %c0_112 = arith.constant 0 : index
    %122 = vector.load %arg17[%c8_111, %c0_112] : memref<32x32xf32, #tpu.memory_space<vmem>>, vector<4x32xf32>
    %c0_113 = arith.constant 0 : index
    %c64_114 = arith.constant 64 : index
    %123 = vector.load %arg22[%c0_113, %c64_114] : memref<8x672xf32, #tpu.memory_space<vmem>>, vector<4x32xf32>
    tpu.vector_store %arg22[%c0_113, %c64_114], %122 {strides = array<i32>} : memref<8x672xf32, #tpu.memory_space<vmem>>, vector<4x32xf32>,
    %c9_115 = arith.constant 9 : index
    %c0_116 = arith.constant 0 : index
    %124 = vector.load %arg17[%c9_115, %c0_116] : memref<32x32xf32, #tpu.memory_space<vmem>>, vector<4x32xf32>
    %c0_117 = arith.constant 0 : index
    %c96_118 = arith.constant 96 : index
    %125 = vector.load %arg22[%c0_117, %c96_118] : memref<8x672xf32, #tpu.memory_space<vmem>>, vector<4x32xf32>
    tpu.vector_store %arg22[%c0_117, %c96_118], %124 {strides = array<i32>} : memref<8x672xf32, #tpu.memory_space<vmem>>, vector<4x32xf32>,
    %c10_119 = arith.constant 10 : index
    %c0_120 = arith.constant 0 : index
    %126 = vector.load %arg17[%c10_119, %c0_120] : memref<32x32xf32, #tpu.memory_space<vmem>>, vector<4x32xf32>
    %c0_121 = arith.constant 0 : index
    %c128_122 = arith.constant 128 : index
    %127 = vector.load %arg22[%c0_121, %c128_122] : memref<8x672xf32, #tpu.memory_space<vmem>>, vector<4x32xf32>
    tpu.vector_store %arg22[%c0_121, %c128_122], %126 {strides = array<i32>} : memref<8x672xf32, #tpu.memory_space<vmem>>, vector<4x32xf32>,
    %c11_123 = arith.constant 11 : index
    %c0_124 = arith.constant 0 : index
    %128 = vector.load %arg17[%c11_123, %c0_124] : memref<32x32xf32, #tpu.memory_space<vmem>>, vector<4x32xf32>
    %c0_125 = arith.constant 0 : index
    %c160_126 = arith.constant 160 : index
    %129 = vector.load %arg22[%c0_125, %c160_126] : memref<8x672xf32, #tpu.memory_space<vmem>>, vector<4x32xf32>
    tpu.vector_store %arg22[%c0_125, %c160_126], %128 {strides = array<i32>} : memref<8x672xf32, #tpu.memory_space<vmem>>, vector<4x32xf32>,
    %c12_127 = arith.constant 12 : index
    %c0_128 = arith.constant 0 : index
    %130 = vector.load %arg17[%c12_127, %c0_128] : memref<32x32xf32, #tpu.memory_space<vmem>>, vector<4x32xf32>
    %c0_129 = arith.constant 0 : index
    %c192 = arith.constant 192 : index
    %131 = vector.load %arg22[%c0_129, %c192] : memref<8x672xf32, #tpu.memory_space<vmem>>, vector<4x32xf32>
    tpu.vector_store %arg22[%c0_129, %c192], %130 {strides = array<i32>} : memref<8x672xf32, #tpu.memory_space<vmem>>, vector<4x32xf32>,
    %c13_130 = arith.constant 13 : index
    %c0_131 = arith.constant 0 : index
    %132 = vector.load %arg17[%c13_130, %c0_131] : memref<32x32xf32, #tpu.memory_space<vmem>>, vector<4x32xf32>
    %c0_132 = arith.constant 0 : index
    %c224 = arith.constant 224 : index
    %133 = vector.load %arg22[%c0_132, %c224] : memref<8x672xf32, #tpu.memory_space<vmem>>, vector<4x32xf32>
    tpu.vector_store %arg22[%c0_132, %c224], %132 {strides = array<i32>} : memref<8x672xf32, #tpu.memory_space<vmem>>, vector<4x32xf32>,
    %c14 = arith.constant 14 : index
    %c0_133 = arith.constant 0 : index
    %134 = vector.load %arg17[%c14, %c0_133] : memref<32x32xf32, #tpu.memory_space<vmem>>, vector<4x32xf32>
    %c0_134 = arith.constant 0 : index
    %c256 = arith.constant 256 : index
    %135 = vector.load %arg22[%c0_134, %c256] : memref<8x672xf32, #tpu.memory_space<vmem>>, vector<4x32xf32>
    tpu.vector_store %arg22[%c0_134, %c256], %134 {strides = array<i32>} : memref<8x672xf32, #tpu.memory_space<vmem>>, vector<4x32xf32>,
    %c15 = arith.constant 15 : index
    %c0_135 = arith.constant 0 : index
    %136 = vector.load %arg17[%c15, %c0_135] : memref<32x32xf32, #tpu.memory_space<vmem>>, vector<4x32xf32>
    %c0_136 = arith.constant 0 : index
    %c288 = arith.constant 288 : index
    %137 = vector.load %arg22[%c0_136, %c288] : memref<8x672xf32, #tpu.memory_space<vmem>>, vector<4x32xf32>
    tpu.vector_store %arg22[%c0_136, %c288], %136 {strides = array<i32>} : memref<8x672xf32, #tpu.memory_space<vmem>>, vector<4x32xf32>,
    %c16_137 = arith.constant 16 : index
    %c0_138 = arith.constant 0 : index
    %138 = vector.load %arg17[%c16_137, %c0_138] : memref<32x32xf32, #tpu.memory_space<vmem>>, vector<4x32xf32>
    %c0_139 = arith.constant 0 : index
    %c320 = arith.constant 320 : index
    %139 = vector.load %arg22[%c0_139, %c320] : memref<8x672xf32, #tpu.memory_space<vmem>>, vector<4x32xf32>
    tpu.vector_store %arg22[%c0_139, %c320], %138 {strides = array<i32>} : memref<8x672xf32, #tpu.memory_space<vmem>>, vector<4x32xf32>,
    %c17 = arith.constant 17 : index
    %c0_140 = arith.constant 0 : index
    %140 = vector.load %arg17[%c17, %c0_140] : memref<32x32xf32, #tpu.memory_space<vmem>>, vector<4x32xf32>
    %c0_141 = arith.constant 0 : index
    %c352 = arith.constant 352 : index
    %141 = vector.load %arg22[%c0_141, %c352] : memref<8x672xf32, #tpu.memory_space<vmem>>, vector<4x32xf32>
    tpu.vector_store %arg22[%c0_141, %c352], %140 {strides = array<i32>} : memref<8x672xf32, #tpu.memory_space<vmem>>, vector<4x32xf32>,
    %c18 = arith.constant 18 : index
    %c0_142 = arith.constant 0 : index
    %142 = vector.load %arg17[%c18, %c0_142] : memref<32x32xf32, #tpu.memory_space<vmem>>, vector<4x32xf32>
    %c0_143 = arith.constant 0 : index
    %c384 = arith.constant 384 : index
    %143 = vector.load %arg22[%c0_143, %c384] : memref<8x672xf32, #tpu.memory_space<vmem>>, vector<4x32xf32>
    tpu.vector_store %arg22[%c0_143, %c384], %142 {strides = array<i32>} : memref<8x672xf32, #tpu.memory_space<vmem>>, vector<4x32xf32>,
    %c19 = arith.constant 19 : index
    %c0_144 = arith.constant 0 : index
    %144 = vector.load %arg17[%c19, %c0_144] : memref<32x32xf32, #tpu.memory_space<vmem>>, vector<4x32xf32>
    %c0_145 = arith.constant 0 : index
    %c416 = arith.constant 416 : index
    %145 = vector.load %arg22[%c0_145, %c416] : memref<8x672xf32, #tpu.memory_space<vmem>>, vector<4x32xf32>
    tpu.vector_store %arg22[%c0_145, %c416], %144 {strides = array<i32>} : memref<8x672xf32, #tpu.memory_space<vmem>>, vector<4x32xf32>,
    %c20_146 = arith.constant 20 : index
    %c0_147 = arith.constant 0 : index
    %146 = vector.load %arg17[%c20_146, %c0_147] : memref<32x32xf32, #tpu.memory_space<vmem>>, vector<4x32xf32>
    %c0_148 = arith.constant 0 : index
    %c448 = arith.constant 448 : index
    %147 = vector.load %arg22[%c0_148, %c448] : memref<8x672xf32, #tpu.memory_space<vmem>>, vector<4x32xf32>
    tpu.vector_store %arg22[%c0_148, %c448], %146 {strides = array<i32>} : memref<8x672xf32, #tpu.memory_space<vmem>>, vector<4x32xf32>,
    %c21 = arith.constant 21 : index
    %c0_149 = arith.constant 0 : index
    %148 = vector.load %arg17[%c21, %c0_149] : memref<32x32xf32, #tpu.memory_space<vmem>>, vector<4x32xf32>
    %c0_150 = arith.constant 0 : index
    %c480 = arith.constant 480 : index
    %149 = vector.load %arg22[%c0_150, %c480] : memref<8x672xf32, #tpu.memory_space<vmem>>, vector<4x32xf32>
    tpu.vector_store %arg22[%c0_150, %c480], %148 {strides = array<i32>} : memref<8x672xf32, #tpu.memory_space<vmem>>, vector<4x32xf32>,
    %c22 = arith.constant 22 : index
    %c0_151 = arith.constant 0 : index
    %150 = vector.load %arg17[%c22, %c0_151] : memref<32x32xf32, #tpu.memory_space<vmem>>, vector<4x32xf32>
    %c0_152 = arith.constant 0 : index
    %c512 = arith.constant 512 : index
    %151 = vector.load %arg22[%c0_152, %c512] : memref<8x672xf32, #tpu.memory_space<vmem>>, vector<4x32xf32>
    tpu.vector_store %arg22[%c0_152, %c512], %150 {strides = array<i32>} : memref<8x672xf32, #tpu.memory_space<vmem>>, vector<4x32xf32>,
    %c23 = arith.constant 23 : index
    %c0_153 = arith.constant 0 : index
    %152 = vector.load %arg17[%c23, %c0_153] : memref<32x32xf32, #tpu.memory_space<vmem>>, vector<4x32xf32>
    %c0_154 = arith.constant 0 : index
    %c544 = arith.constant 544 : index
    %153 = vector.load %arg22[%c0_154, %c544] : memref<8x672xf32, #tpu.memory_space<vmem>>, vector<4x32xf32>
    tpu.vector_store %arg22[%c0_154, %c544], %152 {strides = array<i32>} : memref<8x672xf32, #tpu.memory_space<vmem>>, vector<4x32xf32>,
    %c24 = arith.constant 24 : index
    %c0_155 = arith.constant 0 : index
    %154 = vector.load %arg17[%c24, %c0_155] : memref<32x32xf32, #tpu.memory_space<vmem>>, vector<4x32xf32>
    %c0_156 = arith.constant 0 : index
    %c576 = arith.constant 576 : index
    %155 = vector.load %arg22[%c0_156, %c576] : memref<8x672xf32, #tpu.memory_space<vmem>>, vector<4x32xf32>
    tpu.vector_store %arg22[%c0_156, %c576], %154 {strides = array<i32>} : memref<8x672xf32, #tpu.memory_space<vmem>>, vector<4x32xf32>,
    %c25 = arith.constant 25 : index
    %c0_157 = arith.constant 0 : index
    %156 = vector.load %arg17[%c25, %c0_157] : memref<32x32xf32, #tpu.memory_space<vmem>>, vector<4x32xf32>
    %c0_158 = arith.constant 0 : index
    %c608 = arith.constant 608 : index
    %157 = vector.load %arg22[%c0_158, %c608] : memref<8x672xf32, #tpu.memory_space<vmem>>, vector<4x32xf32>
    tpu.vector_store %arg22[%c0_158, %c608], %156 {strides = array<i32>} : memref<8x672xf32, #tpu.memory_space<vmem>>, vector<4x32xf32>,
    %c26 = arith.constant 26 : index
    %c0_159 = arith.constant 0 : index
    %158 = vector.load %arg17[%c26, %c0_159] : memref<32x32xf32, #tpu.memory_space<vmem>>, vector<4x32xf32>
    %c0_160 = arith.constant 0 : index
    %c640 = arith.constant 640 : index
    %159 = vector.load %arg22[%c0_160, %c640] : memref<8x672xf32, #tpu.memory_space<vmem>>, vector<4x32xf32>
    tpu.vector_store %arg22[%c0_160, %c640], %158 {strides = array<i32>} : memref<8x672xf32, #tpu.memory_space<vmem>>, vector<4x32xf32>,
    %c0_161 = arith.constant 0 : index
    %c0_162 = arith.constant 0 : index
    %160 = vector.load %arg22[%c0_161, %c0_162] : memref<8x672xf32, #tpu.memory_space<vmem>>, vector<4x672xf32>
    %161 = arith.truncf %160 : vector<4x672xf32> to vector<4x672xbf16>
    %c0_163 = arith.constant 0 : index
    %c0_164 = arith.constant 0 : index
    %162 = vector.load %arg6[%c0_163, %c0_164] : memref<672x64xbf16, #tpu.memory_space<vmem>>, vector<672x64xbf16>
    %cst_165 = arith.constant dense<0.000000e+00> : vector<4x64xf32>
    %163 = tpu.matmul %161, %162, %cst_165 {dimension_numbers = #tpu.dot_dimension_numbers<[1], [0], [0], [1], [0, 0, 1, 1], [], []>} : vector<4x672xbf16>, vector<672x64xbf16>, vector<4x64xf32> -> vector<4x64xf32>
    %c0_166 = arith.constant 0 : index
    %c0_167 = arith.constant 0 : index
    %164 = vector.load %arg7[%c0_166, %c0_167] : memref<1x64xf32, #tpu.memory_space<vmem>>, vector<1x64xf32>
    %165 = vector.broadcast %164 : vector<1x64xf32> to vector<4x64xf32>
    %166 = arith.addf %163, %165 : vector<4x64xf32>
    %cst_168 = arith.constant dense<0.000000e+00> : vector<64xf32>
    %167 = vector.multi_reduction <add>, %166, %cst_168 [0] : vector<4x64xf32> to vector<64xf32>
    %168 = vector.shape_cast %167 : vector<64xf32> to vector<1x64xf32>
    %cst_169 = arith.constant 4.000000e+00 : f32
    %169 = vector.broadcast %cst_169 : f32 to vector<1x64xf32>
    %170 = arith.divf %168, %169 : vector<1x64xf32>
    %171 = vector.broadcast %170 : vector<1x64xf32> to vector<4x64xf32>
    %172 = arith.subf %166, %171 : vector<4x64xf32>
    %173 = arith.mulf %172, %172 : vector<4x64xf32>
    %cst_170 = arith.constant dense<0.000000e+00> : vector<64xf32>
    %174 = vector.multi_reduction <add>, %173, %cst_170 [0] : vector<4x64xf32> to vector<64xf32>
    %175 = vector.shape_cast %174 : vector<64xf32> to vector<1x64xf32>
    %cst_171 = arith.constant 4.000000e+00 : f32
    %176 = vector.broadcast %cst_171 : f32 to vector<1x64xf32>
    %177 = arith.divf %175, %176 : vector<1x64xf32>
    %178 = vector.broadcast %170 : vector<1x64xf32> to vector<4x64xf32>
    %179 = arith.subf %166, %178 : vector<4x64xf32>
    %cst_172 = arith.constant 9.99999974E-6 : f32
    %180 = vector.broadcast %cst_172 : f32 to vector<1x64xf32>
    %181 = arith.addf %177, %180 : vector<1x64xf32>
    %182 = math.rsqrt %181 : vector<1x64xf32>
    %183 = vector.broadcast %182 : vector<1x64xf32> to vector<4x64xf32>
    %184 = arith.mulf %179, %183 : vector<4x64xf32>
    %cst_173 = arith.constant 0.000000e+00 : f32
    %185 = vector.broadcast %cst_173 : f32 to vector<4x64xf32>
    %186 = arith.cmpf ogt, %184, %185 : vector<4x64xf32>
    %187 = vector.broadcast %2 : vector<1x1xf32> to vector<4x64xf32>
    %188 = arith.mulf %187, %184 : vector<4x64xf32>
    %189 = arith.select %186, %184, %188 : vector<4x64xi1>, vector<4x64xf32>
    %190 = arith.truncf %189 : vector<4x64xf32> to vector<4x64xbf16>
    %c0_174 = arith.constant 0 : index
    %c0_175 = arith.constant 0 : index
    %191 = vector.load %arg8[%c0_174, %c0_175] : memref<64x64xbf16, #tpu.memory_space<vmem>>, vector<64x64xbf16>
    %cst_176 = arith.constant dense<0.000000e+00> : vector<4x64xf32>
    %192 = tpu.matmul %190, %191, %cst_176 {dimension_numbers = #tpu.dot_dimension_numbers<[1], [0], [0], [1], [0, 0, 1, 1], [], []>} : vector<4x64xbf16>, vector<64x64xbf16>, vector<4x64xf32> -> vector<4x64xf32>
    %c0_177 = arith.constant 0 : index
    %c0_178 = arith.constant 0 : index
    %193 = vector.load %arg9[%c0_177, %c0_178] : memref<1x64xf32, #tpu.memory_space<vmem>>, vector<1x64xf32>
    %194 = vector.broadcast %193 : vector<1x64xf32> to vector<4x64xf32>
    %195 = arith.addf %192, %194 : vector<4x64xf32>
    %196 = vector.extract_strided_slice %195 {offsets = [0, 0], sizes = [4, 32], strides = [1, 1]} : vector<4x64xf32> to vector<4x32xf32>
    %197 = vector.extract_strided_slice %195 {offsets = [0, 32], sizes = [4, 32], strides = [1, 1]} : vector<4x64xf32> to vector<4x32xf32>
    %cst_179 = arith.constant dense<0xFF800000> : vector<32xf32>
    %198 = vector.multi_reduction <maximumf>, %197, %cst_179 [0] : vector<4x32xf32> to vector<32xf32>
    %199 = vector.shape_cast %198 : vector<32xf32> to vector<1x32xf32>
    %200 = vector.broadcast %199 : vector<1x32xf32> to vector<4x32xf32>
    %201 = arith.subf %197, %200 : vector<4x32xf32>
    %202 = math.exp %201 : vector<4x32xf32>
    %cst_180 = arith.constant dense<0.000000e+00> : vector<32xf32>
    %203 = vector.multi_reduction <add>, %202, %cst_180 [0] : vector<4x32xf32> to vector<32xf32>
    %204 = vector.shape_cast %203 : vector<32xf32> to vector<1x32xf32>
    %205 = tpu.reciprocal %204 {approx = true} : vector<1x32xf32> -> vector<1x32xf32>
    %206 = vector.broadcast %205 : vector<1x32xf32> to vector<4x32xf32>
    %207 = arith.mulf %202, %206 : vector<4x32xf32>
    %208 = arith.mulf %196, %207 : vector<4x32xf32>
    %209 = vector.extract_strided_slice %208 {offsets = [0, 0], sizes = [1, 32], strides = [1, 1]} : vector<4x32xf32> to vector<1x32xf32>
    %c0_181 = arith.constant 0 : index
    %c0_182 = arith.constant 0 : index
    %210 = vector.load %arg23[%c0_181, %c0_182] : memref<1x128xf32, #tpu.memory_space<vmem>>, vector<1x32xf32>
    tpu.vector_store %arg23[%c0_181, %c0_182], %209 {strides = array<i32>} : memref<1x128xf32, #tpu.memory_space<vmem>>, vector<1x32xf32>,
    %211 = vector.extract_strided_slice %208 {offsets = [1, 0], sizes = [1, 32], strides = [1, 1]} : vector<4x32xf32> to vector<1x32xf32>
    %c0_183 = arith.constant 0 : index
    %c32_184 = arith.constant 32 : index
    %212 = vector.load %arg23[%c0_183, %c32_184] : memref<1x128xf32, #tpu.memory_space<vmem>>, vector<1x32xf32>
    tpu.vector_store %arg23[%c0_183, %c32_184], %211 {strides = array<i32>} : memref<1x128xf32, #tpu.memory_space<vmem>>, vector<1x32xf32>,
    %213 = vector.extract_strided_slice %208 {offsets = [2, 0], sizes = [1, 32], strides = [1, 1]} : vector<4x32xf32> to vector<1x32xf32>
    %c0_185 = arith.constant 0 : index
    %c64_186 = arith.constant 64 : index
    %214 = vector.load %arg23[%c0_185, %c64_186] : memref<1x128xf32, #tpu.memory_space<vmem>>, vector<1x32xf32>
    tpu.vector_store %arg23[%c0_185, %c64_186], %213 {strides = array<i32>} : memref<1x128xf32, #tpu.memory_space<vmem>>, vector<1x32xf32>,
    %215 = vector.extract_strided_slice %208 {offsets = [3, 0], sizes = [1, 32], strides = [1, 1]} : vector<4x32xf32> to vector<1x32xf32>
    %c0_187 = arith.constant 0 : index
    %c96_188 = arith.constant 96 : index
    %216 = vector.load %arg23[%c0_187, %c96_188] : memref<1x128xf32, #tpu.memory_space<vmem>>, vector<1x32xf32>
    tpu.vector_store %arg23[%c0_187, %c96_188], %215 {strides = array<i32>} : memref<1x128xf32, #tpu.memory_space<vmem>>, vector<1x32xf32>,
    %c0_189 = arith.constant 0 : index
    %c0_190 = arith.constant 0 : index
    %217 = vector.load %arg23[%c0_189, %c0_190] : memref<1x128xf32, #tpu.memory_space<vmem>>, vector<1x128xf32>
    %218 = arith.truncf %217 : vector<1x128xf32> to vector<1x128xbf16>
    %c0_191 = arith.constant 0 : index
    %c0_192 = arith.constant 0 : index
    %219 = vector.load %arg10[%c0_191, %c0_192] : memref<128x64xbf16, #tpu.memory_space<vmem>>, vector<128x64xbf16>
    %cst_193 = arith.constant dense<0.000000e+00> : vector<1x64xf32>
    %220 = tpu.matmul %218, %219, %cst_193 {dimension_numbers = #tpu.dot_dimension_numbers<[1], [0], [0], [1], [0, 0, 1, 1], [], []>} : vector<1x128xbf16>, vector<128x64xbf16>, vector<1x64xf32> -> vector<1x64xf32>
    %c0_194 = arith.constant 0 : index
    %c0_195 = arith.constant 0 : index
    %221 = vector.load %arg11[%c0_194, %c0_195] : memref<1x64xf32, #tpu.memory_space<vmem>>, vector<1x64xf32>
    %222 = arith.addf %220, %221 : vector<1x64xf32>
    %cst_196 = arith.constant dense<0.000000e+00> : vector<1xf32>
    %223 = vector.multi_reduction <add>, %222, %cst_196 [1] : vector<1x64xf32> to vector<1xf32>
    %224 = vector.shape_cast %223 : vector<1xf32> to vector<1x1xf32>
    %cst_197 = arith.constant 6.400000e+01 : f32
    %225 = vector.broadcast %cst_197 : f32 to vector<1x1xf32>
    %226 = arith.divf %224, %225 : vector<1x1xf32>
    %227 = vector.broadcast %226 : vector<1x1xf32> to vector<1x64xf32>
    %228 = arith.subf %222, %227 : vector<1x64xf32>
    %229 = arith.mulf %228, %228 : vector<1x64xf32>
    %cst_198 = arith.constant dense<0.000000e+00> : vector<1xf32>
    %230 = vector.multi_reduction <add>, %229, %cst_198 [1] : vector<1x64xf32> to vector<1xf32>
    %231 = vector.shape_cast %230 : vector<1xf32> to vector<1x1xf32>
    %cst_199 = arith.constant 6.400000e+01 : f32
    %232 = vector.broadcast %cst_199 : f32 to vector<1x1xf32>
    %233 = arith.divf %231, %232 : vector<1x1xf32>
    %234 = vector.broadcast %226 : vector<1x1xf32> to vector<1x64xf32>
    %235 = arith.subf %222, %234 : vector<1x64xf32>
    %cst_200 = arith.constant 9.99999974E-6 : f32
    %236 = vector.broadcast %cst_200 : f32 to vector<1x1xf32>
    %237 = arith.addf %233, %236 : vector<1x1xf32>
    %238 = math.rsqrt %237 : vector<1x1xf32>
    %239 = vector.broadcast %238 : vector<1x1xf32> to vector<1x64xf32>
    %240 = arith.mulf %235, %239 : vector<1x64xf32>
    %241 = arith.negf %240 : vector<1x64xf32>
    %242 = math.exp %241 : vector<1x64xf32>
    %cst_201 = arith.constant 1.000000e+00 : f32
    %243 = vector.broadcast %cst_201 : f32 to vector<1x64xf32>
    %244 = arith.addf %243, %242 : vector<1x64xf32>
    %245 = arith.divf %243, %244 : vector<1x64xf32>
    %246 = arith.truncf %245 : vector<1x64xf32> to vector<1x64xbf16>
    %c0_202 = arith.constant 0 : index
    %c0_203 = arith.constant 0 : index
    %247 = vector.load %arg12[%c0_202, %c0_203] : memref<64x3xbf16, #tpu.memory_space<vmem>>, vector<64x3xbf16>
    %cst_204 = arith.constant dense<0.000000e+00> : vector<1x3xf32>
    %248 = tpu.matmul %246, %247, %cst_204 {dimension_numbers = #tpu.dot_dimension_numbers<[1], [0], [0], [1], [0, 0, 1, 1], [], []>} : vector<1x64xbf16>, vector<64x3xbf16>, vector<1x3xf32> -> vector<1x3xf32>
    %c0_205 = arith.constant 0 : index
    %c0_206 = arith.constant 0 : index
    %249 = vector.load %arg13[%c0_205, %c0_206] : memref<1x3xf32, #tpu.memory_space<vmem>>, vector<1x3xf32>
    %250 = arith.addf %248, %249 : vector<1x3xf32>
    %c0_207 = arith.constant 0 : index
    %c0_208 = arith.constant 0 : index
    %c0_209 = arith.constant 0 : index
    %251 = vector.load %arg15[%c0_207, %c0_208, %c0_209] : memref<1x1x3xf32, #tpu.memory_space<vmem>>, vector<1x1x3xf32>
    %252 = vector.shape_cast %251 : vector<1x1x3xf32> to vector<1x3xf32>
    %253 = vector.shape_cast %250 : vector<1x3xf32> to vector<1x1x3xf32>
    tpu.vector_store %arg15[%c0_207, %c0_208, %c0_209], %253 {strides = array<i32>} : memref<1x1x3xf32, #tpu.memory_space<vmem>>, vector<1x1x3xf32>,
    return
  }
  func.func @transform_0(%arg0: i32) -> (i32, i32, i32) {
    %c0_i32 = arith.constant 0 : i32
    %c0_i32_0 = arith.constant 0 : i32
    %c0_i32_1 = arith.constant 0 : i32
    return %arg0, %c0_i32, %c0_i32_0 : i32, i32, i32
  }
  func.func @transform_1(%arg0: i32) -> (i32, i32) {
    %c0_i32 = arith.constant 0 : i32
    %c0_i32_0 = arith.constant 0 : i32
    %c0_i32_1 = arith.constant 0 : i32
    return %c0_i32, %c0_i32_0 : i32, i32
  }
  func.func @transform_2(%arg0: i32) -> (i32, i32) {
    %c0_i32 = arith.constant 0 : i32
    %c0_i32_0 = arith.constant 0 : i32
    %c0_i32_1 = arith.constant 0 : i32
    return %c0_i32, %c0_i32_0 : i32, i32
  }
  func.func @transform_3(%arg0: i32) -> (i32, i32) {
    %c0_i32 = arith.constant 0 : i32
    %c0_i32_0 = arith.constant 0 : i32
    %c0_i32_1 = arith.constant 0 : i32
    return %c0_i32, %c0_i32_0 : i32, i32
  }
  func.func @transform_4(%arg0: i32) -> (i32, i32) {
    %c0_i32 = arith.constant 0 : i32
    %c0_i32_0 = arith.constant 0 : i32
    %c0_i32_1 = arith.constant 0 : i32
    return %c0_i32, %c0_i32_0 : i32, i32
  }
  func.func @transform_5(%arg0: i32) -> (i32, i32) {
    %c0_i32 = arith.constant 0 : i32
    %c0_i32_0 = arith.constant 0 : i32
    %c0_i32_1 = arith.constant 0 : i32
    return %c0_i32, %c0_i32_0 : i32, i32
  }
  func.func @transform_6(%arg0: i32) -> (i32, i32) {
    %c0_i32 = arith.constant 0 : i32
    %c0_i32_0 = arith.constant 0 : i32
    %c0_i32_1 = arith.constant 0 : i32
    return %c0_i32, %c0_i32_0 : i32, i32
  }
  func.func @transform_7(%arg0: i32) -> (i32, i32) {
    %c0_i32 = arith.constant 0 : i32
    %c0_i32_0 = arith.constant 0 : i32
    %c0_i32_1 = arith.constant 0 : i32
    return %c0_i32, %c0_i32_0 : i32, i32
  }
  func.func @transform_8(%arg0: i32) -> (i32, i32) {
    %c0_i32 = arith.constant 0 : i32
    %c0_i32_0 = arith.constant 0 : i32
    %c0_i32_1 = arith.constant 0 : i32
    return %c0_i32, %c0_i32_0 : i32, i32
  }
  func.func @transform_9(%arg0: i32) -> (i32, i32) {
    %c0_i32 = arith.constant 0 : i32
    %c0_i32_0 = arith.constant 0 : i32
    %c0_i32_1 = arith.constant 0 : i32
    return %c0_i32, %c0_i32_0 : i32, i32
  }
  func.func @transform_10(%arg0: i32) -> (i32, i32) {
    %c0_i32 = arith.constant 0 : i32
    %c0_i32_0 = arith.constant 0 : i32
    %c0_i32_1 = arith.constant 0 : i32
    return %c0_i32, %c0_i32_0 : i32, i32
  }
  func.func @transform_11(%arg0: i32) -> (i32, i32) {
    %c0_i32 = arith.constant 0 : i32
    %c0_i32_0 = arith.constant 0 : i32
    %c0_i32_1 = arith.constant 0 : i32
    return %c0_i32, %c0_i32_0 : i32, i32
  }
  func.func @transform_12(%arg0: i32) -> (i32, i32) {
    %c0_i32 = arith.constant 0 : i32
    %c0_i32_0 = arith.constant 0 : i32
    %c0_i32_1 = arith.constant 0 : i32
    return %c0_i32, %c0_i32_0 : i32, i32
  }
  func.func @transform_13(%arg0: i32) -> (i32, i32) {
    %c0_i32 = arith.constant 0 : i32
    %c0_i32_0 = arith.constant 0 : i32
    %c0_i32_1 = arith.constant 0 : i32
    return %c0_i32, %c0_i32_0 : i32, i32
  }
  func.func @transform_14(%arg0: i32) -> (i32, i32, i32) {
    %c0_i32 = arith.constant 0 : i32
    %c0_i32_0 = arith.constant 0 : i32
    %c0_i32_1 = arith.constant 0 : i32
    return %arg0, %c0_i32, %c0_i32_0 : i32, i32, i32
  }
}

</mosaic_0001>

<bundles_post_ra>
// kernel: mlstm_fcn_forward.1
= control target key start
LH: loop header
LB: loop body
LE: loop exit
PB: predicated region body
PF: predicated region fallthrough
CT: control target
= control target key end

     0   :  { %s2902_s0 = inlined_call_operand.vmem [shape: f32[2,24,4], index: 0, kind: input, shape index: {}]   ;;  %s2903_s1 = inlined_call_operand.vmem [shape: bf16[20,16], index: 1, kind: input, shape index: {}]   ;;  %s2904_s2 = inlined_call_operand.vmem [shape: f32[1,16], index: 2, kind: input, shape index: {}]   ;;  %s2905_s3 = inlined_call_operand.vmem [shape: bf16[176,32], index: 3, kind: input, shape index: {}]   ;;  %s2906_s4 = inlined_call_operand.vmem [shape: f32[1,32], index: 4, kind: input, shape index: {}]   ;;  %s2907_s5 = inlined_call_operand.vmem [shape: bf16[672,64], index: 5, kind: input, shape index: {}]   ;;  %s2908_s6 = inlined_call_operand.vmem [shape: f32[1,64], index: 6, kind: input, shape index: {}]   ;;  %s2909_s7 = inlined_call_operand.vmem [shape: bf16[64,64], index: 7, kind: input, shape index: {}]   ;;  %s2910_s8 = inlined_call_operand.vmem [shape: f32[1,64], index: 8, kind: input, shape index: {}]   ;;  %s2911_s9 = inlined_call_operand.vmem [shape: bf16[128,64], index: 9, kind: input, shape index: {}]   ;;  %s2912_s10 = inlined_call_operand.vmem [shape: f32[1,64], index: 10, kind: input, shape index: {}]   ;;  %s2913_s11 = inlined_call_operand.vmem [shape: bf16[64,3], index: 11, kind: input, shape index: {}]   ;;  %s2914_s12 = inlined_call_operand.vmem [shape: f32[1,3], index: 12, kind: input, shape index: {}]   ;;  %s2915_s13 = inlined_call_operand.vmem [shape: f32[1,3], index: 13, kind: input, shape index: {}]   ;;  %s2916_s14 = inlined_call_operand.hbm [shape: f32[2,1,3], index: 14, kind: output, shape index: {}]  }
   0x1   :  { %2925 = sst [smem:[#allocation13_spill]] %s2902_s0 }
   0x2   :  { %2926 = sst [smem:[#allocation14_spill]] %s2903_s1 }
   0x3   :  { %2927 = sst [smem:[#allocation15_spill]] %s2904_s2 }
   0x4   :  { %2928 = sst [smem:[#allocation16_spill]] %s2905_s3 }
   0x5   :  { %19 = vsyncpa [#allocation11], 0 }
   0x6   :  { %21 = vsyncpa [#allocation11 + $0x1], 0  ;;  %s2421_s29 = smov 0   ;;  %s2423_s30 = smov 0  }
   0x7   :  { %s2425_s15 = smov 0   ;;  %s2427_s16 = smov 0  }
   0x8 LB: > { %s2442_s17 = sadd.s32 4294967295, %s2328_s16   ;;  %s1912_s18 = sadd.s32 4294967294, %s2328_s16   ;;  %s2328_s16 = sphi %s2427_s16, %s2942_s16   ;;  %s2324_s15 = sphi %s2425_s15, %s2941_s15   ;;  %s2320_s30 = sphi %s2423_s30, %s2940_s30   ;;  %s2316_s29 = sphi %s2421_s29, %s2939_s29  }
   0x9   : > { %s2446_s19 = sadd.s32 1, %s2328_s16   ;;  %s333_s20 = sadd.s32 1, %s2324_s15 }
   0xa   : > { %s330_s21 = ssub.s32 %s2328_s16, %s2446_s19  ;;  %p343_p0 = scmp.ne.s32.totalorder %s2324_s15, %s2320_s30 }
   0xb   : > { %p331_p1 = scmp.eq.s32.totalorder %s330_s21, 0  ;;  %p344_p2 = scmp.eq.s32.totalorder %s2442_s17, 1 }
   0xc   : > { %p349_p3 = scmp.ne.s32.totalorder %s2320_s30, %s2316_s29  ;;  %p350_p4 = scmp.eq.s32.totalorder %s1912_s18, 1 }
   0xd   : > { %s2457_s22 = scalar_select %p331_p1, %s2324_s15, %s333_s20  }
   0xe   : > { %p2459_p5 = por %p344_p2, %p343_p0  ;;  %p2463_p6 = por %p350_p4, %p349_p3 }
   0xf   : > { %p1915_p7 = scmp.ge.s32.totalorder %s2328_s16, 1  ;;  %p415_p8 = scmp.lt.s32.totalorder %s2328_s16, 3 }
  0x11   : > { %p416_p9 = pnand %p1915_p7, %p415_p8 }
  0x12   : > { %p460_p10 = scmp.lt.s32.totalorder (!%p416_p9), %s2442_s17, 1  ;;  %s2931_s0 = sld [smem:[#allocation13_spill]] (!%p416_p9)  ;;  %vm469_vm0 = vcmask (!%p416_p9), 31744   ;;  %v2332_v4 = vmov (!%p416_p9), 0.0   ;;  %vm2333_vm1 = vmmov (!%p416_p9), 0   ;;  %vm550_vm2 = vcmask (!%p416_p9), 1041408  }
  0x13   : > { %419 = sbr.rel (%p416_p9) target bundleno = 2612 (0xa34), region = 76  ;;  %s2330_s20 = smov (!%p416_p9), 8   ;;  %2068 = vmatprep.subr.bf16.mxu0 (!%p416_p9), %v2332_v4  ;;  %2072 = vmatprep.mubr.msk.bf16.mxu0 (!%p416_p9), %vm2333_vm1, %v2332_v4  ;;  %v2335_v14 = vmov (!%p416_p9), 0   ;;  %v2501_v15 = vld [vmem:[%s2915_s13] ss:$0 sm:$0xff] (!%p416_p9)  ;;  %vm482_vm3 = vcmask (!%p416_p9), 64544  }
  0x14   : > { %s2331_s21 = smov (!%p416_p9), 4   ;;  %s2932_s1 = sld [smem:[#allocation14_spill]] (!%p416_p9)  ;;  %2175 = vset.pattern.permute.xlu0 (!%p416_p9), %v2335_v14  ;;  %817 = vmatprep.subr.bf16.mxu1 (!%p416_p9), %v2335_v14  ;;  %vm495_vm4 = vcmask (!%p416_p9), 97344   ;;  %vm508_vm5 = vcmask (!%p416_p9), 130144   ;;  %vm521_vm6 = vcmask (!%p416_p9), 162944   ;;  %vm546_vm7 = vcmask (!%p416_p9), 162816  }
  0x15   : > { %vm595_vm8 = vcmask (!%p416_p9), 130048   ;;  %s2933_s3 = sld [smem:[#allocation16_spill]] (!%p416_p9)  ;;  %s2934_s2 = sld [smem:[#allocation15_spill]] (!%p416_p9)  ;;  %vm656_vm11 = vcmask (!%p416_p9), 261248   ;;  %vm663_vm12 = vcmask (!%p416_p9), 392448   ;;  %vm670_vm13 = vcmask (!%p416_p9), 523648  }
  0x16   : > { %646 = vst.msk [vmem:[#allocation2] sm:$0xff] (!%p416_p9), %vm595_vm8, %v2332_v4  ;;  %647 = vst.msk [vmem:[#allocation2 + $0x10] sm:$0xff] (!%p416_p9), %vm595_vm8, %v2332_v4  ;;  %s2338_s27 = smov (!%p416_p9), 80   ;;  %s2919_s28 = smov (!%p416_p9), 32   ;;  %vm677_vm14 = vcmask (!%p416_p9), 654848   ;;  %vm684_vm15 = vcmask (!%p416_p9), 786048  }
  0x1a   : > { %s461_s25 = scalar_select %p460_p10, %s2442_s17, 1  ;;  %v2179_v7 = vld [vmem:[%s2932_s1] sm:$0xff]   ;;  %v2180_v9 = vld [vmem:[%s2932_s1 + $0x8] ss:$0 sps:$4 sm:$0x33]  }
  0x1b   : > { %2069 = vmatpush3.bf16.msra.mxu0 %v2179_v7  ;;  %v552_v11 = vsel %vm550_vm2, %v2180_v9, 0  ;;  %v2181_v27 = vld [vmem:[%s2933_s3] sm:$0xff]   ;;  %v2182_v28 = vld [vmem:[%s2933_s3 + $0x8] sm:$0xff]   ;;  %v2183_v29 = vld [vmem:[%s2933_s3 + $0x10] sm:$0xff]   ;;  %vm698_vm2 = vcmask 1048448   ;;  %s2937_s1 = smov 96  }
  0x1c   : > { %s2120_s26 = smul.u32 24, %s461_s25  ;;  %2070 = vmatprep.subr.bf16.mxu0 %v2332_v4  ;;  %818 = vmatpush1.bf16.msra.mxu1 %v2181_v27  ;;  %v2184_v30 = vld [vmem:[%s2933_s3 + $0x18] sm:$0xff]   ;;  %v1917_v31 = vld [vmem:[%s2934_s2] ss:$0 sm:$0xff]  ;;  %s2342_s25 = smov 112  }
  0x1d   : > { %819 = vmatprep.subr.bf16.mxu1 %v2335_v14 }
  0x1e   : > { %s2474_s18 = scalar_lea.vmem %s2931_s0, %s2120_s26  ;;  %s2334_s0 = smov 12  }
  0x1f   : > { %v485_v0 = vld [vmem:[%s2474_s18 + $0x2] sm:$0xff]  ;;  %v486_v2 = vld [vmem:[%s2474_s18 + $0xa] sm:$0xff]  ;;  %2071 = vmatpush3.bf16.msra.mxu0 %v552_v11 }
  0x20   : > { %v472_v1 = vld [vmem:[%s2474_s18 + $0x1] sm:$0xff]  ;;  %489 = vrot.lane.b32.xlu1 %v485_v0, %s2330_s20  ;;  %v473_v3 = vld [vmem:[%s2474_s18 + $0x9] sm:$0xff]  ;;  %820 = vmatpush1.bf16.msra.mxu1 %v2182_v28 }
  0x21   : > { %476 = vrot.lane.b32.xlu0 %v472_v1, %s2331_s21  ;;  %v467_v5 = vld [vmem:[%s2474_s18] sm:$0xff]  ;;  %v468_v6 = vld [vmem:[%s2474_s18 + $0x8] sm:$0xff]  ;;  %821 = vmatprep.subr.bf16.mxu1 %v2335_v14 }
  0x22   : > { %v499_v8 = vld [vmem:[%s2474_s18 + $0xb] sm:$0xff]  ;;  %470 = vst.msk [vmem:[#allocation6] sm:$0xff] %vm469_vm0, %v467_v5  ;;  %471 = vst.msk [vmem:[#allocation6 + $0x8] sm:$0xff] %vm469_vm0, %v468_v6  ;;  %v498_v10 = vld [vmem:[%s2474_s18 + $0x3] sm:$0xff]  ;;  %vm691_vm0 = vcmask 917248  }
  0x23   : > { %v512_v12 = vld [vmem:[%s2474_s18 + $0xc] sm:$0xff]  ;;  %v511_v13 = vld [vmem:[%s2474_s18 + $0x4] sm:$0xff]  ;;  %s2935_s18 = smov 16  }
  0x24   : > { %491 = vrot.lane.b32.xlu1 %v486_v2, %s2330_s20  ;;  %s2917_s20 = smov 16   ;;  %822 = vmatpush1.bf16.msra.mxu1 %v2183_v29  ;;  %v2191_v29 = vld [vmem:[%s2933_s3 + $0x50] sm:$0xff]  }
  0x25   : > { %478 = vrot.lane.b32.xlu0 %v473_v3, %s2331_s21  ;;  %823 = vmatprep.subr.bf16.mxu1 %v2335_v14  ;;  %s2936_s21 = smov 32  }
  0x28   : > { %504 = vrot.lane.b32.xlu1 %v499_v8, %s2334_s0  ;;  %824 = vmatpush1.bf16.msra.mxu1 %v2184_v30  ;;  %v2185_v8 = vld [vmem:[%s2933_s3 + $0x20] sm:$0xff]  }
  0x29   : > { %502 = vrot.lane.b32.xlu0 %v498_v10, %s2334_s0  ;;  %825 = vmatprep.subr.bf16.mxu1 %v2335_v14  ;;  %s2337_s0 = smov 48  }
  0x2c   : > { %517 = vrot.lane.b32.xlu1 %v512_v12, %s2917_s20  ;;  %826 = vmatpush1.bf16.msra.mxu1 %v2185_v8  ;;  %v2186_v12 = vld [vmem:[%s2933_s3 + $0x28] sm:$0xff]  }
  0x2d   : > { %515 = vrot.lane.b32.xlu0 %v511_v13, %s2917_s20  ;;  %827 = vmatprep.subr.bf16.mxu1 %v2335_v14  ;;  %v2187_v13 = vld [vmem:[%s2933_s3 + $0x30] sm:$0xff]   ;;  %s2921_s20 = smov 64  }
  0x30   : > { %828 = vmatpush1.bf16.msra.mxu1 %v2186_v12 }
  0x31   : > { %633 = vperm.xlu0 %2175, %v2501_v15   ;;  %829 = vmatprep.subr.bf16.mxu1 %v2335_v14 }
  0x34   : > { %830 = vmatpush1.bf16.msra.mxu1 %v2187_v13 }
  0x35   : > { %831 = vmatprep.subr.bf16.mxu1 %v2335_v14 }
  0x92   : > { %v490_v16 = vpop.permute.xlu1 %489 }
  0x93   : > { %v477_v17 = vpop.permute.xlu0 %476 }
  0x94   : > { %483 = vst.msk [vmem:[#allocation6] sm:$0xff] %vm482_vm3, %v477_v17 }
  0x95   : > { %496 = vst.msk [vmem:[#allocation6] sm:$0xff] %vm495_vm4, %v490_v16 }
  0x96   : > { %v492_v18 = vpop.permute.xlu1 %491 }
  0x97   : > { %v479_v19 = vpop.permute.xlu0 %478 }
  0x98   : > { %484 = vst.msk [vmem:[#allocation6 + $0x8] sm:$0xff] %vm482_vm3, %v479_v19  ;;  %vm813_vm3 = vcmask 392192  }
  0x99   : > { %497 = vst.msk [vmem:[#allocation6 + $0x8] sm:$0xff] %vm495_vm4, %v492_v18  ;;  %vm857_vm4 = vcmask 261120  }
  0x9a   : > { %v505_v20 = vpop.permute.xlu1 %504  ;;  %892 = vst.msk [vmem:[#allocation3] sm:$0xff] %vm857_vm4, %v2332_v4  ;;  %893 = vst.msk [vmem:[#allocation3 + $0x8] sm:$0xff] %vm857_vm4, %v2332_v4 }
  0x9b   : > { %v503_v21 = vpop.permute.xlu0 %502  ;;  %510 = vst.msk [vmem:[#allocation6 + $0x8] sm:$0xff] %vm508_vm5, %v505_v20  ;;  %v2188_v20 = vld [vmem:[%s2933_s3 + $0x38] sm:$0xff]  }
  0x9c   : > { %509 = vst.msk [vmem:[#allocation6] sm:$0xff] %vm508_vm5, %v503_v21  ;;  %832 = vmatpush1.bf16.msra.mxu1 %v2188_v20  ;;  %vm895_vm5 = vcmask 257024  }
  0x9d   : > { %833 = vmatprep.subr.bf16.mxu1 %v2335_v14  ;;  %894 = vst.msk [vmem:[#allocation3 + $0x14] sm:$0xff] %vm857_vm4, %v2332_v4 }
  0x9e   : > { %v518_v22 = vpop.permute.xlu1 %517  ;;  %896 = vst.msk [vmem:[#allocation3 + $0x1c] sm:$0xf] %vm895_vm5, %v2332_v4 }
  0x9f   : > { %v516_v23 = vpop.permute.xlu0 %515  ;;  %523 = vst.msk [vmem:[#allocation6 + $0x8] sm:$0xff] %vm521_vm6, %v518_v22 }
  0xa0   : > { %522 = vst.msk [vmem:[#allocation6] sm:$0xff] %vm521_vm6, %v516_v23  ;;  %v2189_v23 = vld [vmem:[%s2933_s3 + $0x40] sm:$0xff]   ;;  %vm905_vm6 = vcmask 519424  }
  0xa1   : > { %834 = vmatpush1.bf16.msra.mxu1 %v2189_v23 }
  0xa2   : > { %835 = vmatprep.subr.bf16.mxu1 %v2335_v14 }
  0xa6   : > { %v525_v25 = vld [vmem:[#allocation6 + $0x8] sm:$0xff] }
  0xa7   : > { %v524_v24 = vld [vmem:[#allocation6] sm:$0xff] }
  0xa8   : > { %v526_v26 = vpack.c.bf16 %v525_v25, %v524_v24 }
  0xaa   : > { %2073 = vmatmul.mubr.msk.bf16.vlgmr.msra.gmra.mrb[0].mxu0 %vm546_vm7, %v526_v26  ;;  %v2190_v26 = vld [vmem:[%s2933_s3 + $0x48] sm:$0xff]   ;;  %vm912_vm7 = vcmask 781824  }
  0xab   : > { %836 = vmatpush1.bf16.msra.mxu1 %v2190_v26 }
  0xac   : > { %837 = vmatprep.subr.bf16.mxu1 %v2335_v14 }
  0xaf   : > { %838 = vmatpush1.bf16.msra.mxu1 %v2191_v29 }
  0xb0   : > { %v634_v0 = vpop.permute.xlu0 %633  ;;  %1441 = vmatprep.subr.bf16.mxu1 %v2335_v14 }
 0x17d   : > { %v588_v32 = vpop.f32.mrb[0].mxu0 }
 0x17e   : > { %v589_v33 = vadd.f32 %v1917_v31, %v588_v32  ;;  %v2074_v34 = vpop.f32.mrb[1].mxu0 }
 0x17f   : > { %v591_v35 = vpop.f32.mrb[2].mxu0 }
 0x180   : > { %v592_v36 = vadd.f32 %v1917_v31, %v591_v35  ;;  %v2075_v37 = vpop.f32.mrb[3].mxu0  ;;  %v596_v38 = vsel %vm595_vm8, %v589_v33, 0.0  ;;  %v2343_v31 = vmov 1  }
 0x181   : > { %2176 = vset.pattern.permute.xlu1 %v2343_v31 }
 0x182   : > { %v597_v39 = vsel %vm595_vm8, %v592_v36, 0.0 }
 0x183   : > { %v598_v40 = vadd.f32 %v597_v39, %v596_v38 }
 0x185   : > { %v599_v41 = vrot.slane %v598_v40, 4 }
 0x187   : > { %v600_v42 = vadd.f32 %v599_v41, %v598_v40 }
 0x189   : > { %v601_v43 = vrot.slane %v600_v42, 2 }
 0x18b   : > { %v602_v44 = vadd.f32 %v601_v43, %v600_v42 }
 0x18d   : > { %v603_v45 = vrot.slane %v602_v44, 1 }
 0x18f   : > { %v604_v46 = vadd.f32 %v603_v45, %v602_v44  ;;  %v900_v45 = vld [vmem:[#allocation3 + $0x7] sm:$0xf] }
 0x191   : > { %v606_v47 = vmul.f32 0.0625, %v604_v46  ;;  %v923_v46 = vld [vmem:[#allocation3 + $0xb] sm:$0xf] }
 0x193   : > { %v607_v48 = vsub.f32 %v589_v33, %v606_v47  ;;  %v608_v49 = vsub.f32 %v592_v36, %v606_v47  ;;  %v907_v47 = vld [vmem:[#allocation3 + $0x8] sm:$0xf] }
 0x195   : > { %v609_v50 = vmul.f32 %v607_v48, %v607_v48  ;;  %v610_v51 = vmul.f32 %v608_v49, %v608_v49 }
 0x197   : > { %v611_v52 = vsel %vm595_vm8, %v609_v50, 0.0  ;;  %v612_v53 = vsel %vm595_vm8, %v610_v51, 0.0  ;;  %v2192_v50 = vld [vmem:[%s2907_s5 + $0x40] sm:$0xff]  }
 0x198   : > { %v613_v54 = vadd.f32 %v612_v53, %v611_v52  ;;  %v2193_v51 = vld [vmem:[%s2907_s5] sm:$0xff]   ;;  %v2194_v52 = vld [vmem:[%s2907_s5 + $0x48] sm:$0xff]   ;;  %2005 = vmatprep.subr.bf16.mxu0 %v2192_v50 }
 0x199   : > { %v898_v53 = vld [vmem:[#allocation3 + $0x6] sm:$0xf]  ;;  %2006 = vmatpush3.bf16.msra.mxu0 %v2193_v51  ;;  %v969_v51 = vld [vmem:[#allocation3 + $0x14] sm:$0xf] }
 0x19a   : > { %v614_v55 = vrot.slane %v613_v54, 4  ;;  %899 = vst.msk [vmem:[#allocation8] sm:$0xf] %vm895_vm5, %v898_v53  ;;  %2007 = vmatprep.subr.bf16.mxu0 %v2194_v52  ;;  %v2212_v53 = vld [vmem:[%s2907_s5 + $0x110] sm:$0xff]  }
 0x19c   : > { %v615_v56 = vadd.f32 %v614_v55, %v613_v54  ;;  %v2195_v54 = vld [vmem:[%s2907_s5 + $0x8] sm:$0xff]   ;;  %v921_v55 = vld [vmem:[#allocation3 + $0xa] sm:$0xf] }
 0x19d   : > { %922 = vst.msk [vmem:[#allocation8 + $0x8] sm:$0xf] %vm895_vm5, %v921_v55  ;;  %2008 = vmatpush3.bf16.msra.mxu0 %v2195_v54  ;;  %v2215_v55 = vld [vmem:[%s2907_s5 + $0x118] sm:$0xff]  }
 0x19e   : > { %v616_v57 = vrot.slane %v615_v56, 2 }
 0x1a0   : > { %v617_v58 = vadd.f32 %v616_v57, %v615_v56  ;;  %v2196_v56 = vld [vmem:[%s2907_s5 + $0x50] sm:$0xff]  }
 0x1a1   : > { %v2197_v57 = vld [vmem:[%s2907_s5 + $0x10] sm:$0xff]   ;;  %2009 = vmatprep.subr.bf16.mxu0 %v2196_v56 }
 0x1a2   : > { %v618_v59 = vrot.slane %v617_v58, 1  ;;  %2010 = vmatpush3.bf16.msra.mxu0 %v2197_v57  ;;  %v975_v56 = vld [vmem:[#allocation3 + $0x15] sm:$0xf] }
 0x1a4   : > { %v619_v60 = vadd.f32 %v618_v59, %v617_v58  ;;  %v2198_v58 = vld [vmem:[%s2907_s5 + $0x58] sm:$0xff]  }
 0x1a5   : > { %v2199_v59 = vld [vmem:[%s2907_s5 + $0x18] sm:$0xff]   ;;  %2011 = vmatprep.subr.bf16.mxu0 %v2198_v58  ;;  %v2218_v58 = vld [vmem:[%s2907_s5 + $0x120] sm:$0xff]  }
 0x1a6   : > { %v620_v61 = vmul.f32 0.0625, %v619_v60  ;;  %v2200_v60 = vld [vmem:[%s2907_s5 + $0x60] sm:$0xff]   ;;  %2012 = vmatpush3.bf16.msra.mxu0 %v2199_v59  ;;  %v989_v59 = vld [vmem:[#allocation3 + $0x18] sm:$0xf] }
 0x1a7   : > { %2013 = vmatprep.subr.bf16.mxu0 %v2200_v60 }
 0x1a8   : > { %v621_v62 = vadd.f32 1e-05, %v620_v61  ;;  %v2201_v61 = vld [vmem:[%s2907_s5 + $0x20] sm:$0xff]  }
 0x1aa   : > { %2250 = vrsqrt.f32 %v621_v62  ;;  %v2202_v62 = vld [vmem:[%s2907_s5 + $0x68] sm:$0xff]   ;;  %2014 = vmatpush3.bf16.msra.mxu0 %v2201_v61 }
 0x1ab   : > { %2015 = vmatprep.subr.bf16.mxu0 %v2202_v62  ;;  %v2221_v61 = vld [vmem:[%s2907_s5 + $0x128] sm:$0xff]  }
 0x1ac   : > { %v983_v62 = vld [vmem:[#allocation3 + $0x17] sm:$0xf] }
 0x1b4   : > { %v2251_v63 = vpop.eup %2250 }
 0x1b5   : > { %v624_v1 = vmul.f32 %v2251_v63, %v608_v49  ;;  %v623_v2 = vmul.f32 %v2251_v63, %v607_v48  ;;  %v929_v48 = vld [vmem:[#allocation3 + $0xc] sm:$0xf]  ;;  %v2203_v63 = vld [vmem:[%s2907_s5 + $0x28] sm:$0xff]  }
 0x1b6   : > { %v914_v49 = vld [vmem:[#allocation3 + $0x9] sm:$0xf]  ;;  %2016 = vmatpush3.bf16.msra.mxu0 %v2203_v63  ;;  %v2224_v63 = vld [vmem:[%s2907_s5 + $0x130] sm:$0xff]  }
 0x1b7   : > { %vm625_vm9 = vcmp.gt.f32.partialorder %v623_v2, 0.0  ;;  %vm626_vm10 = vcmp.gt.f32.partialorder %v624_v1, 0.0  ;;  %v636_v3 = vmul.f32 %v634_v0, %v623_v2  ;;  %v637_v5 = vmul.f32 %v634_v0, %v624_v1  ;;  %v1922_v0 = vld [vmem:[%s2906_s4] ss:$0 sm:$0xff] }
 0x1b9   : > { %v638_v6 = vsel %vm625_vm9, %v623_v2, %v636_v3  ;;  %v639_v7 = vsel %vm626_vm10, %v624_v1, %v637_v5  ;;  %vm1481_vm10 = vcmask 519168  }
 0x1ba   : > { %640 = vst.msk [vmem:[#allocation4] sm:$0xff] %vm595_vm8, %v638_v6  ;;  %641 = vst.msk [vmem:[#allocation4 + $0x8] sm:$0xff] %vm595_vm8, %v639_v7 }
 0x1c1   : > { %v642_v9 = vld [vmem:[#allocation4] ss:$2 sm:$0xff]  ;;  %v644_v10 = vld [vmem:[#allocation4 + $0x1] ss:$2 sm:$0xff] }
 0x1c2   : > { %v645_v11 = vmax.f32 %v642_v9, %v644_v10 }
 0x1c4   : > { %648 = vst.msk [vmem:[#allocation2 + $0x8] sm:$0xff] %vm595_vm8, %v645_v11 }
 0x1cb   : > { %v665_v16 = vld [vmem:[#allocation2 + $0x6] sm:$0xff] }
 0x1cc   : > { %v651_v17 = vld [vmem:[#allocation2 + $0x4] sm:$0xff]  ;;  %667 = vrot.lane.b32.xlu0 %v665_v16, %s2337_s0  ;;  %s2923_s0 = smov 96   ;;  %v702_v28 = vld [vmem:[#allocation2 + $0xc] sm:$0xff] }
 0x1cd   : > { %653 = vrot.lane.b32.xlu1 %v651_v17, %s2935_s18  ;;  %v649_v18 = vld [vmem:[#allocation2 + $0x3] sm:$0xff]  ;;  %v700_v19 = vld [vmem:[#allocation2 + $0xb] sm:$0xff] }
 0x1ce   : > { %v679_v21 = vld [vmem:[#allocation2 + $0x8] sm:$0xff]  ;;  %650 = vst.msk [vmem:[#allocation7] sm:$0xff] %vm595_vm8, %v649_v18  ;;  %701 = vst.msk [vmem:[#allocation7 + $0x8] sm:$0xff] %vm595_vm8, %v700_v19  ;;  %vm919_vm8 = vcmask 1044224  }
 0x1cf   : > { %v658_v22 = vld [vmem:[#allocation2 + $0x5] sm:$0xff]  ;;  %v708_v30 = vld [vmem:[#allocation2 + $0xd] sm:$0xff] }
 0x1d0   : > { %681 = vrot.lane.b32.xlu0 %v679_v21, %s2338_s27  ;;  %v686_v24 = vld [vmem:[#allocation2 + $0x9] sm:$0xff]  ;;  %s2345_s27 = smov [#allocation10]  }
 0x1d1   : > { %660 = vrot.lane.b32.xlu1 %v658_v22, %s2919_s28  ;;  %v672_v25 = vld [vmem:[#allocation2 + $0x7] sm:$0xff]  ;;  %s2270_s26 = sshll.u32 %s2345_s27, 4  ;;  %s2271_s26 = int_to_ptr.vmem [resolvable:$false] %s2270_s26 }
 0x1d2   : > { %v693_v27 = vld [vmem:[#allocation2 + $0xa] sm:$0xff] }
 0x1d4   : > { %688 = vrot.lane.b32.xlu0 %v686_v24, %s2923_s0 }
 0x1d5   : > { %674 = vrot.lane.b32.xlu1 %v672_v25, %s2921_s20 }
 0x1d8   : > { %695 = vrot.lane.b32.xlu0 %v693_v27, %s2342_s25  ;;  %s458_s25 = sand.u32 1, %s2320_s30  }
 0x1d9   : > { %704 = vrot.lane.b32.xlu1 %v702_v28, %s2935_s18 }
 0x1dc   : > { %925 = vrot.lane.b32.xlu0 %v923_v46, %s2936_s21  ;;  %v2209_v46 = vld [vmem:[%s2907_s5 + $0x108] sm:$0xff]  }
 0x1dd   : > { %710 = vrot.lane.b32.xlu1 %v708_v30, %s2936_s21 }
 0x1e0   : > { %931 = vrot.lane.b32.xlu0 %v929_v48, %s2921_s20 }
 0x1e1   : > { %882 = vperm.xlu1 %2176, %v2501_v15  }
 0x1e5   : > { %902 = vrot.lane.b32.xlu1 %v900_v45, %s2936_s21  ;;  %v2208_v45 = vld [vmem:[%s2907_s5 + $0x38] sm:$0xff]  }
 0x1e9   : > { %909 = vrot.lane.b32.xlu1 %v907_v47, %s2921_s20  ;;  %v2210_v47 = vld [vmem:[%s2907_s5 + $0xc0] sm:$0xff]   ;;  %s2938_s20 = smov 64  }
 0x1ed   : > { %916 = vrot.lane.b32.xlu1 %v914_v49, %s2923_s0  ;;  %s2272_s0 = scalar_lea.vmem %s2271_s26, 32 }
 0x23e   : > { %v668_v32 = vpop.permute.xlu0 %667 }
 0x23f   : > { %v654_v33 = vpop.permute.xlu1 %653 }
 0x240   : > { %657 = vst.msk [vmem:[#allocation7] sm:$0xff] %vm656_vm11, %v654_v33 }
 0x242   : > { %v682_v34 = vpop.permute.xlu0 %681 }
 0x243   : > { %v661_v35 = vpop.permute.xlu1 %660 }
 0x244   : > { %664 = vst.msk [vmem:[#allocation7] sm:$0xff] %vm663_vm12, %v661_v35 }
 0x245   : > { %671 = vst.msk [vmem:[#allocation7] sm:$0xff] %vm670_vm13, %v668_v32  ;;  %vm1625_vm13 = vcmask 517377  }
 0x246   : > { %v689_v36 = vpop.permute.xlu0 %688 }
 0x247   : > { %v675_v37 = vpop.permute.xlu1 %674 }
 0x248   : > { %678 = vst.msk [vmem:[#allocation7] sm:$0xff] %vm677_vm14, %v675_v37  ;;  %vm1630_vm14 = vcmask 780802  }
 0x249   : > { %685 = vst.msk [vmem:[#allocation7] sm:$0xff] %vm684_vm15, %v682_v34  ;;  %vm1635_vm15 = vcmask 1044227  }
 0x24a   : > { %692 = vst.msk [vmem:[#allocation7] sm:$0xff] %vm691_vm0, %v689_v36  ;;  %v696_v38 = vpop.permute.xlu0 %695  ;;  %vm1744_vm0 = vcmask 516096  }
 0x24b   : > { %v705_v39 = vpop.permute.xlu1 %704  ;;  %699 = vst.msk [vmem:[#allocation7] sm:$0xff] %vm698_vm2, %v696_v38  ;;  %v2204_v38 = vld [vmem:[%s2907_s5 + $0x70] sm:$0xff]   ;;  %vm1842_vm2 = vcmask 16384  }
 0x24c   : > { %707 = vst.msk [vmem:[#allocation7 + $0x8] sm:$0xff] %vm656_vm11, %v705_v39  ;;  %v2205_v39 = vld [vmem:[%s2907_s5 + $0x30] sm:$0xff]   ;;  %2017 = vmatprep.subr.bf16.mxu0 %v2204_v38 }
 0x24d   : > { %2018 = vmatpush3.bf16.msra.mxu0 %v2205_v39  ;;  %v2228_v39 = vld [vmem:[%s2907_s5 + $0xf0] sm:$0xff]  }
 0x24e   : > { %v926_v30 = vpop.permute.xlu0 %925 }
 0x24f   : > { %v711_v40 = vpop.permute.xlu1 %710  ;;  %928 = vst.msk [vmem:[#allocation8 + $0x8] sm:$0xf] %vm905_vm6, %v926_v30  ;;  %v2220_v30 = vld [vmem:[%s2907_s5 + $0x98] sm:$0xff]  }
 0x250   : > { %713 = vst.msk [vmem:[#allocation7 + $0x8] sm:$0xff] %vm663_vm12, %v711_v40  ;;  %vm1551_vm12 = vcmask 523264  }
 0x252   : > { %v714_v41 = vld [vmem:[#allocation7] sm:$0xff]  ;;  %v932_v32 = vpop.permute.xlu0 %931 }
 0x253   : > { %v716_v44 = vpack.c.bf16 %v714_v41, %v714_v41  ;;  %934 = vst.msk [vmem:[#allocation8 + $0x8] sm:$0xf] %vm912_vm7, %v932_v32 }
 0x257   : > { %v715_v42 = vld [vmem:[#allocation7 + $0x8] sm:$0xff] }
 0x258   : > { %v717_v43 = vpack.c.bf16 %v715_v42, %v715_v42 }
 0x25a   : > { %1934 = vmatprep.mubr.msk.bf16.mxu1 %vm813_vm3, %v717_v43  ;;  %v2206_v43 = vld [vmem:[%s2907_s5 + $0x100] sm:$0xff]  }
 0x25b   : > { %850 = vmatmul.mubr.bf16.vlgmr.msra.gmra.mrb[0].mxu1 %v716_v44  ;;  %v2207_v44 = vld [vmem:[%s2907_s5 + $0x78] sm:$0xff]  }
 0x25c   : > { %1442 = vmatpush1.bf16.msra.mxu1 %v2206_v43  ;;  %2019 = vmatprep.subr.bf16.mxu0 %v2207_v44 }
 0x25d   : > { %2020 = vmatpush3.bf16.msra.mxu0 %v2208_v45  ;;  %1443 = vmatprep.subr.bf16.mxu1 %v2335_v14  ;;  %v2234_v45 = vld [vmem:[%s2909_s7] sm:$0xff]  }
 0x25e   : > { %2027 = vmatprep.subr.bf16.mxu0 %v2210_v47  ;;  %v2236_v47 = vld [vmem:[%s2909_s7 + $0x10] sm:$0xff]  }
 0x260   : > { %v883_v28 = vpop.permute.xlu1 %882  ;;  %1444 = vmatpush1.bf16.msra.mxu1 %v2209_v46  ;;  %v2235_v46 = vld [vmem:[%s2909_s7 + $0x8] sm:$0xff]  }
 0x261   : > { %1445 = vmatprep.subr.bf16.mxu1 %v2335_v14 }
 0x264   : > { %v903_v29 = vpop.permute.xlu1 %902  ;;  %1446 = vmatpush1.bf16.msra.mxu1 %v2212_v53 }
 0x265   : > { %906 = vst.msk [vmem:[#allocation8] sm:$0xf] %vm905_vm6, %v903_v29  ;;  %1447 = vmatprep.subr.bf16.mxu1 %v2335_v14 }
 0x268   : > { %v910_v31 = vpop.permute.xlu1 %909  ;;  %1448 = vmatpush1.bf16.msra.mxu1 %v2215_v55 }
 0x269   : > { %913 = vst.msk [vmem:[#allocation8] sm:$0xf] %vm912_vm7, %v910_v31  ;;  %1449 = vmatprep.subr.bf16.mxu1 %v2335_v14  ;;  %v2222_v31 = vld [vmem:[%s2907_s5 + $0xe0] sm:$0xff]  }
 0x26c   : > { %v917_v35 = vpop.permute.xlu1 %916  ;;  %1450 = vmatpush1.bf16.msra.mxu1 %v2218_v58  ;;  %v1935_v58 = vld [vmem:[%s2908_s6] ss:$0 sm:$0xff] }
 0x26d   : > { %920 = vst.msk [vmem:[#allocation8] sm:$0xf] %vm919_vm8, %v917_v35  ;;  %1451 = vmatprep.subr.bf16.mxu1 %v2335_v14  ;;  %v2225_v35 = vld [vmem:[%s2907_s5 + $0xe8] sm:$0xff]  }
 0x270   : > { %1452 = vmatpush1.bf16.msra.mxu1 %v2221_v61 }
 0x271   : > { %1453 = vmatprep.subr.bf16.mxu1 %v2335_v14 }
 0x274   : > { %1454 = vmatpush1.bf16.msra.mxu1 %v2224_v63 }
 0x275   : > { %1455 = vmatprep.subr.bf16.mxu1 %v2335_v14 }
 0x32e   : > { %v851_v1 = vpop.f32.mrb[0].mxu1 }
 0x32f   : > { %v852_v2 = vadd.f32 %v1922_v0, %v851_v1  ;;  %v853_v3 = vpop.f32.mrb[1].mxu1  ;;  %v981_v0 = vld [vmem:[#allocation3 + $0x16] sm:$0xf] }
 0x330   : > { %v854_v5 = vpop.f32.mrb[2].mxu1  ;;  %982 = vst.msk [vmem:[#allocation8 + $0x20] sm:$0xf] %vm895_vm5, %v981_v0  ;;  %v995_v1 = vld [vmem:[#allocation3 + $0x19] sm:$0xf] }
 0x331   : > { %v858_v6 = vsel %vm857_vm4, %v852_v2, 0.0  ;;  %v855_v7 = vpop.f32.mrb[3].mxu1  ;;  %v1001_v3 = vld [vmem:[#allocation3 + $0x1a] sm:$0xf]  ;;  %v2230_v5 = vld [vmem:[%s2907_s5 + $0x140] sm:$0xff]  }
 0x332   : > { %v859_v8 = vrot.slane %v858_v6, 4  ;;  %1002 = vst.msk [vmem:[#allocation8 + $0x28] sm:$0xf] %vm895_vm5, %v1001_v3 }
 0x334   : > { %v860_v9 = vadd.f32 %v859_v8, %v858_v6  ;;  %v2233_v6 = vld [vmem:[%s2907_s5 + $0x148] sm:$0xff]  }
 0x336   : > { %v861_v10 = vrot.slane %v860_v9, 2 }
 0x338   : > { %v862_v11 = vadd.f32 %v861_v10, %v860_v9  ;;  %v2344_v9 = vmov 2  }
 0x339   : > { %v1008_v7 = vld [vmem:[#allocation8 + $0x28] sm:$0xf]  ;;  %2177 = vset.pattern.permute.xlu1 %v2344_v9  ;;  %2178 = vset.pattern.permute.xlu0 %v2344_v9 }
 0x33a   : > { %v863_v12 = vrot.slane %v862_v11, 1  ;;  %v1014_v8 = vpack.c.bf16 %v1008_v7, %v1008_v7 }
 0x33c   : > { %v864_v13 = vadd.f32 %v863_v12, %v862_v11  ;;  %1978 = vmatprep.mubr.msk.bf16.mxu1 %vm857_vm4, %v1014_v8 }
 0x33e   : > { %v866_v16 = vmul.f32 0.125, %v864_v13  ;;  %v1003_v13 = vld [vmem:[#allocation8] sm:$0xf] }
 0x340   : > { %v867_v17 = vsub.f32 %v852_v2, %v866_v16  ;;  %v2227_v2 = vld [vmem:[%s2907_s5 + $0x138] sm:$0xff]  }
 0x341   : > { %1456 = vmatpush1.bf16.msra.mxu1 %v2227_v2 }
 0x342   : > { %v868_v18 = vmul.f32 %v867_v17, %v867_v17  ;;  %1457 = vmatprep.subr.bf16.mxu1 %v2335_v14 }
 0x344   : > { %v869_v19 = vsel %vm857_vm4, %v868_v18, 0.0 }
 0x345   : > { %v870_v20 = vrot.slane %v869_v19, 4  ;;  %1458 = vmatpush1.bf16.msra.mxu1 %v2230_v5 }
 0x346   : > { %1459 = vmatprep.subr.bf16.mxu1 %v2335_v14 }
 0x347   : > { %v871_v21 = vadd.f32 %v870_v20, %v869_v19  ;;  %v2211_v20 = vld [vmem:[%s2907_s5 + $0x80] sm:$0xff]  }
 0x349   : > { %v872_v22 = vrot.slane %v871_v21, 2  ;;  %1460 = vmatpush1.bf16.msra.mxu1 %v2233_v6 }
 0x34a   : > { %2088 = vmatprep.subr.bf16.mxu1 %v2332_v4 }
 0x34b   : > { %v873_v23 = vadd.f32 %v872_v22, %v871_v21  ;;  %v2213_v21 = vld [vmem:[%s2907_s5 + $0xc8] sm:$0xff]  }
 0x34d   : > { %v874_v24 = vrot.slane %v873_v23, 1 }
 0x34f   : > { %v875_v25 = vadd.f32 %v874_v24, %v873_v23  ;;  %v2214_v23 = vld [vmem:[%s2907_s5 + $0x88] sm:$0xff]   ;;  %v2216_v24 = vld [vmem:[%s2907_s5 + $0xd0] sm:$0xff]  }
 0x351   : > { %v876_v26 = vmul.f32 0.125, %v875_v25 }
 0x353   : > { %v877_v27 = vadd.f32 1e-05, %v876_v26 }
 0x355   : > { %2252 = vrsqrt.f32 %v877_v27  ;;  %v2217_v27 = vld [vmem:[%s2907_s5 + $0x90] sm:$0xff]  }
 0x35f   : > { %v2253_v33 = vpop.eup %2252 }
 0x360   : > { %v879_v34 = vmul.f32 %v2253_v33, %v867_v17 }
 0x362   : > { %vm880_vm9 = vcmp.gt.f32.partialorder %v879_v34, 0.0  ;;  %v885_v36 = vmul.f32 %v883_v28, %v879_v34  ;;  %v2219_v28 = vld [vmem:[%s2907_s5 + $0xd8] sm:$0xff]  }
 0x364   : > { %v886_v37 = vsel %vm880_vm9, %v879_v34, %v885_v36  ;;  %v2223_v34 = vld [vmem:[%s2907_s5 + $0xa0] sm:$0xff]  }
 0x365   : > { %887 = vst.msk [vmem:[#allocation5] sm:$0xff] %vm857_vm4, %v886_v37  ;;  %v2226_v37 = vld [vmem:[%s2907_s5 + $0xa8] sm:$0xff]  }
 0x36c   : > { %v888_v40 = vld [vmem:[#allocation5] ss:$2 sm:$0xf]  ;;  %v890_v41 = vld [vmem:[#allocation5 + $0x1] ss:$2 sm:$0xf] }
 0x36d   : > { %v891_v42 = vmax.f32 %v888_v40, %v890_v41  ;;  %v2229_v40 = vld [vmem:[%s2907_s5 + $0xb0] sm:$0xff]   ;;  %v2231_v41 = vld [vmem:[%s2907_s5 + $0xf8] sm:$0xff]  }
 0x36f   : > { %897 = vst.msk [vmem:[#allocation3 + $0x10] sm:$0xf] %vm895_vm5, %v891_v42  ;;  %v2232_v42 = vld [vmem:[%s2907_s5 + $0xb8] sm:$0xff]  }
 0x376   : > { %v943_v48 = vld [vmem:[#allocation3 + $0xf] sm:$0xf]  ;;  %v963_v60 = vld [vmem:[#allocation3 + $0x13] sm:$0xf] }
 0x377   : > { %v935_v49 = vld [vmem:[#allocation3 + $0xd] sm:$0xf]  ;;  %945 = vrot.lane.b32.xlu1 %v943_v48, %s2936_s21  ;;  %v961_v52 = vld [vmem:[#allocation3 + $0x12] sm:$0xf]  ;;  %v2237_v48 = vld [vmem:[%s2909_s7 + $0x18] sm:$0xff]  }
 0x378   : > { %937 = vrot.lane.b32.xlu0 %v935_v49, %s2937_s1  ;;  %v941_v50 = vld [vmem:[#allocation3 + $0xe] sm:$0xf]  ;;  %962 = vst.msk [vmem:[#allocation8 + $0x18] sm:$0xf] %vm895_vm5, %v961_v52 }
 0x379   : > { %942 = vst.msk [vmem:[#allocation8 + $0x10] sm:$0xf] %vm895_vm5, %v941_v50  ;;  %v949_v54 = vld [vmem:[#allocation3 + $0x10] sm:$0xf] }
 0x37a   : > { %v955_v57 = vld [vmem:[#allocation3 + $0x11] sm:$0xf] }
 0x37b   : > { %951 = vrot.lane.b32.xlu1 %v949_v54, %s2938_s20 }
 0x37c   : > { %971 = vrot.lane.b32.xlu0 %v969_v51, %s2938_s20 }
 0x37f   : > { %957 = vrot.lane.b32.xlu1 %v955_v57, %s2937_s1 }
 0x380   : > { %977 = vrot.lane.b32.xlu0 %v975_v56, %s2937_s1 }
 0x383   : > { %991 = vrot.lane.b32.xlu1 %v989_v59, %s2938_s20 }
 0x384   : > { %965 = vrot.lane.b32.xlu0 %v963_v60, %s2936_s21 }
 0x387   : > { %1506 = vperm.xlu1 %2177, %v2501_v15   ;;  %v1009_v15 = vpack.c.bf16 %v1003_v13, %v1003_v13 }
 0x388   : > { %985 = vrot.lane.b32.xlu0 %v983_v62, %s2936_s21 }
 0x38c   : > { %997 = vrot.lane.b32.xlu0 %v995_v1, %s2937_s1 }
 0x3e9   : > { %v946_v10 = vpop.permute.xlu1 %945 }
 0x3ea   : > { %v938_v11 = vpop.permute.xlu0 %937  ;;  %948 = vst.msk [vmem:[#allocation8 + $0x10] sm:$0xf] %vm905_vm6, %v946_v10 }
 0x3eb   : > { %940 = vst.msk [vmem:[#allocation8 + $0x8] sm:$0xf] %vm919_vm8, %v938_v11 }
 0x3ed   : > { %v952_v12 = vpop.permute.xlu1 %951 }
 0x3ee   : > { %v972_v14 = vpop.permute.xlu0 %971  ;;  %954 = vst.msk [vmem:[#allocation8 + $0x10] sm:$0xf] %vm912_vm7, %v952_v12 }
 0x3f1   : > { %v958_v16 = vpop.permute.xlu1 %957 }
 0x3f2   : > { %v978_v17 = vpop.permute.xlu0 %977  ;;  %v1004_v18 = vld [vmem:[#allocation8 + $0x8] sm:$0xf]  ;;  %960 = vst.msk [vmem:[#allocation8 + $0x10] sm:$0xf] %vm919_vm8, %v958_v16 }
 0x3f3   : > { %v1010_v19 = vpack.c.bf16 %v1004_v18, %v1004_v18 }
 0x3f5   : > { %1393 = vmatprep.mubr.bf16.mxu0 %v1010_v19  ;;  %v992_v25 = vpop.permute.xlu1 %991 }
 0x3f6   : > { %1394 = vmatmul.mubr.bf16.vlgmr.msra.gmra.mrb[4].mxu0 %v1009_v15  ;;  %v966_v22 = vpop.permute.xlu0 %965 }
 0x3f7   : > { %2028 = vmatpush3.bf16.msra.mxu0 %v2211_v20  ;;  %968 = vst.msk [vmem:[#allocation8 + $0x18] sm:$0xf] %vm905_vm6, %v966_v22 }
 0x3f8   : > { %974 = vst.msk [vmem:[#allocation8 + $0x18] sm:$0xf] %vm912_vm7, %v972_v14  ;;  %2029 = vmatprep.subr.bf16.mxu0 %v2213_v21 }
 0x3f9   : > { %980 = vst.msk [vmem:[#allocation8 + $0x18] sm:$0xf] %vm919_vm8, %v978_v17  ;;  %v1005_v43 = vld [vmem:[#allocation8 + $0x10] sm:$0xf] }
 0x3fa   : > { %v986_v26 = vpop.permute.xlu0 %985  ;;  %v1011_v44 = vpack.c.bf16 %v1005_v43, %v1005_v43 }
 0x3fb   : > { %2030 = vmatpush3.bf16.msra.mxu0 %v2214_v23  ;;  %988 = vst.msk [vmem:[#allocation8 + $0x20] sm:$0xf] %vm905_vm6, %v986_v26 }
 0x3fc   : > { %2031 = vmatprep.subr.bf16.mxu0 %v2216_v24  ;;  %994 = vst.msk [vmem:[#allocation8 + $0x20] sm:$0xf] %vm912_vm7, %v992_v25 }
 0x3fe   : > { %v998_v29 = vpop.permute.xlu0 %997 }
 0x3ff   : > { %2032 = vmatpush3.bf16.msra.mxu0 %v2217_v27  ;;  %1000 = vst.msk [vmem:[#allocation8 + $0x20] sm:$0xf] %vm919_vm8, %v998_v29  ;;  %v1979_v29 = vld [vmem:[%s2910_s8] ss:$0 sm:$0xff] }
 0x400   : > { %2033 = vmatprep.subr.bf16.mxu0 %v2219_v28  ;;  %v1006_v32 = vld [vmem:[#allocation8 + $0x18] sm:$0xf] }
 0x401   : > { %v1012_v33 = vpack.c.bf16 %v1006_v32, %v1006_v32 }
 0x403   : > { %2034 = vmatpush3.bf16.msra.mxu0 %v2220_v30  ;;  %1433 = vmatprep.mubr.bf16.mxu0 %v1012_v33 }
 0x404   : > { %2035 = vmatprep.subr.bf16.mxu0 %v2222_v31 }
 0x406   : > { %v1007_v36 = vld [vmem:[#allocation8 + $0x20] sm:$0xf]  ;;  %v1507_v24 = vpop.permute.xlu1 %1506 }
 0x407   : > { %2036 = vmatpush3.bf16.msra.mxu0 %v2223_v34  ;;  %v1013_v38 = vpack.c.bf16 %v1007_v36, %v1007_v36 }
 0x408   : > { %2037 = vmatprep.subr.bf16.mxu0 %v2225_v35 }
 0x409   : > { %1474 = vmatmul.mubr.bf16.vlgmr.msra.gmra.mrb[4].mxu1 %v1013_v38 }
 0x40a   : > { %2104 = vmatprep.mubr.msk.bf16.mxu1 %vm2333_vm1, %v2332_v4 }
 0x40b   : > { %2038 = vmatpush3.bf16.msra.mxu0 %v2226_v37 }
 0x40c   : > { %2039 = vmatprep.subr.bf16.mxu0 %v2228_v39 }
 0x40f   : > { %2040 = vmatpush3.bf16.msra.mxu0 %v2229_v40 }
 0x410   : > { %2041 = vmatprep.subr.bf16.mxu0 %v2231_v41 }
 0x413   : > { %2042 = vmatpush3.bf16.msra.mxu0 %v2232_v42 }
 0x414   : > { %2076 = vmatprep.subr.bf16.mxu0 %v2332_v4 }
 0x416   : > { %1434 = vmatmul.mubr.bf16.vlgmr.msra.gmra.mrb[8].mxu0 %v1011_v44 }
 0x417   : > { %2084 = vmatprep.mubr.msk.bf16.mxu0 %vm2333_vm1, %v2332_v4  ;;  %2077 = vmatpush3.bf16.msra.mxu0 %v2234_v45 }
 0x418   : > { %2078 = vmatprep.subr.bf16.mxu0 %v2332_v4 }
 0x41b   : > { %2079 = vmatpush3.bf16.msra.mxu0 %v2235_v46 }
 0x41c   : > { %2080 = vmatprep.subr.bf16.mxu0 %v2332_v4 }
 0x41f   : > { %2081 = vmatpush3.bf16.msra.mxu0 %v2236_v47 }
 0x420   : > { %2082 = vmatprep.subr.bf16.mxu0 %v2332_v4 }
 0x423   : > { %2083 = vmatpush3.bf16.msra.mxu0 %v2237_v48 }
 0x424   : > { %2108 = vmatprep.subr.bf16.mxu0 %v2332_v4 }
 0x4c9   : > { %v2021_v49 = vpop.f32.mrb[4].mxu0 }
 0x4ca   : > { %v2022_v50 = vpop.f32.mrb[5].mxu0 }
 0x4cb   : > { %v2023_v51 = vadd.f32 %v2022_v50, %v2021_v49  ;;  %v2024_v52 = vpop.f32.mrb[6].mxu0 }
 0x4cc   : > { %v2025_v53 = vpop.f32.mrb[7].mxu0  ;;  %v2238_v52 = vld [vmem:[%s2911_s9] sm:$0xff]  }
 0x4cd   : > { %v1396_v61 = vadd.f32 %v2023_v51, %v1935_v58  ;;  %2089 = vmatpush3.bf16.msra.mxu1 %v2238_v52  ;;  %v2239_v53 = vld [vmem:[%s2911_s9 + $0x8] sm:$0xff]   ;;  %v2242_v58 = vld [vmem:[%s2911_s9 + $0x20] sm:$0xff]  }
 0x4ce   : > { %2090 = vmatprep.subr.bf16.mxu1 %v2332_v4 }
 0x4d1   : > { %2091 = vmatpush3.bf16.msra.mxu1 %v2239_v53 }
 0x4d2   : > { %2092 = vmatprep.subr.bf16.mxu1 %v2332_v4 }
 0x4dc   : > { %v1475_v54 = vpop.f32.mrb[4].mxu1 }
 0x4dd   : > { %v1477_v55 = vpop.f32.mrb[5].mxu1 }
 0x4de   : > { %v1478_v56 = vpop.f32.mrb[6].mxu1 }
 0x4df   : > { %v1479_v57 = vpop.f32.mrb[7].mxu1  ;;  %v2240_v56 = vld [vmem:[%s2911_s9 + $0x10] sm:$0xff]  }
 0x4e0   : > { %2093 = vmatpush3.bf16.msra.mxu1 %v2240_v56  ;;  %v2241_v57 = vld [vmem:[%s2911_s9 + $0x18] sm:$0xff]  }
 0x4e1   : > { %2094 = vmatprep.subr.bf16.mxu1 %v2332_v4 }
 0x4e4   : > { %2095 = vmatpush3.bf16.msra.mxu1 %v2241_v57 }
 0x4e5   : > { %2096 = vmatprep.subr.bf16.mxu1 %v2332_v4 }
 0x4e8   : > { %2097 = vmatpush3.bf16.msra.mxu1 %v2242_v58 }
 0x4e9   : > { %v2043_v59 = vpop.f32.mrb[8].mxu0  ;;  %2098 = vmatprep.subr.bf16.mxu1 %v2332_v4 }
 0x4ea   : > { %v2044_v60 = vpop.f32.mrb[9].mxu0 }
 0x4eb   : > { %v2045_v62 = vadd.f32 %v2044_v60, %v2043_v59  ;;  %v2046_v63 = vpop.f32.mrb[10].mxu0  ;;  %v2243_v59 = vld [vmem:[%s2911_s9 + $0x28] sm:$0xff]   ;;  %v2244_v60 = vld [vmem:[%s2911_s9 + $0x30] sm:$0xff]  }
 0x4ec   : > { %v2047_v0 = vpop.f32.mrb[11].mxu0  ;;  %2099 = vmatpush3.bf16.msra.mxu1 %v2243_v59 }
 0x4ed   : > { %v1436_v1 = vadd.f32 %v2045_v62, %v1396_v61  ;;  %2100 = vmatprep.subr.bf16.mxu1 %v2332_v4  ;;  %v2245_v61 = vld [vmem:[%s2911_s9 + $0x38] sm:$0xff]  }
 0x4ef   : > { %v1476_v2 = vadd.f32 %v1475_v54, %v1436_v1 }
 0x4f0   : > { %2101 = vmatpush3.bf16.msra.mxu1 %v2244_v60 }
 0x4f1   : > { %v1482_v3 = vsel %vm1481_vm10, %v1476_v2, 0.0  ;;  %2102 = vmatprep.subr.bf16.mxu1 %v2332_v4 }
 0x4f2   : > { %v1483_v5 = vrot.slane %v1482_v3, 4 }
 0x4f4   : > { %v1484_v6 = vadd.f32 %v1483_v5, %v1482_v3  ;;  %2103 = vmatpush3.bf16.msra.mxu1 %v2245_v61 }
 0x4f6   : > { %v1485_v7 = vrot.slane %v1484_v6, 2 }
 0x4f8   : > { %v1486_v8 = vadd.f32 %v1485_v7, %v1484_v6  ;;  %v1655_v6 = vld [vmem:[%s2912_s10] sm:$0x1] }
 0x4fa   : > { %v1487_v9 = vrot.slane %v1486_v8, 1 }
 0x4fc   : > { %v1488_v10 = vadd.f32 %v1487_v9, %v1486_v8 }
 0x4fe   : > { %v1490_v11 = vmul.f32 0.25, %v1488_v10 }
 0x500   : > { %v1491_v12 = vsub.f32 %v1476_v2, %v1490_v11 }
 0x502   : > { %v1492_v14 = vmul.f32 %v1491_v12, %v1491_v12 }
 0x504   : > { %v1493_v13 = vsel %vm1481_vm10, %v1492_v14, 0.0 }
 0x505   : > { %v1494_v16 = vrot.slane %v1493_v13, 4 }
 0x507   : > { %v1495_v17 = vadd.f32 %v1494_v16, %v1493_v13 }
 0x509   : > { %v1496_v18 = vrot.slane %v1495_v17, 2 }
 0x50b   : > { %v1497_v15 = vadd.f32 %v1496_v18, %v1495_v17 }
 0x50d   : > { %v1498_v19 = vrot.slane %v1497_v15, 1 }
 0x50f   : > { %v1499_v20 = vadd.f32 %v1498_v19, %v1497_v15  ;;  %v2246_v15 = vld [vmem:[%s2913_s11] sm:$0xff]   ;;  %v2247_v19 = vld [vmem:[%s2913_s11 + $0x8] sm:$0xff]  }
 0x511   : > { %v1500_v21 = vmul.f32 0.25, %v1499_v20  ;;  %v2248_v20 = vld [vmem:[%s2913_s11 + $0x10] sm:$0xff]  }
 0x513   : > { %v1501_v22 = vadd.f32 1e-05, %v1500_v21  ;;  %v2249_v21 = vld [vmem:[%s2913_s11 + $0x18] sm:$0xff]  }
 0x515   : > { %2254 = vrsqrt.f32 %v1501_v22 }
 0x51f   : > { %v2255_v23 = vpop.eup %2254 }
 0x520   : > { %v1503_v25 = vmul.f32 %v2255_v23, %v1491_v12 }
 0x522   : > { %vm1504_vm11 = vcmp.gt.f32.partialorder %v1503_v25, 0.0  ;;  %v1509_v26 = vmul.f32 %v1507_v24, %v1503_v25 }
 0x524   : > { %v1510_v27 = vsel %vm1504_vm11, %v1503_v25, %v1509_v26 }
 0x525   : > { %v1511_v28 = vpack.c.bf16 %v1510_v27, %v1510_v27 }
 0x527   : > { %2085 = vmatmul.mubr.msk.bf16.vlgmr.msra.gmra.mrb[12].mxu0 %vm1551_vm12, %v1511_v28 }
 0x528   : > { %2116 = vmatprep.mubr.msk.bf16.mxu0 %vm2333_vm1, %v2332_v4  ;;  %vm1619_vm1 = vcmask 253952   ;;  %2109 = vmatpush3.bf16.msra.mxu0 %v2246_v15 }
 0x529   : > { %2110 = vmatprep.subr.bf16.mxu0 %v2332_v4 }
 0x52c   : > { %2111 = vmatpush3.bf16.msra.mxu0 %v2247_v19 }
 0x52d   : > { %2112 = vmatprep.subr.bf16.mxu0 %v2332_v4 }
 0x530   : > { %2113 = vmatpush3.bf16.msra.mxu0 %v2248_v20 }
 0x531   : > { %2114 = vmatprep.subr.bf16.mxu0 %v2332_v4  ;;  %v1774_v4 = vld [vmem:[%s2914_s12] sm:$0x1] }
 0x534   : > { %2115 = vmatpush3.bf16.msra.mxu0 %v2249_v21 }
 0x5fa   : > { %v1589_v30 = vpop.f32.mrb[12].mxu0 }
 0x5fb   : > { %v1590_v31 = vadd.f32 %v1979_v29, %v1589_v30  ;;  %v2086_v32 = vpop.f32.mrb[13].mxu0 }
 0x5fc   : > { %v1592_v33 = vpop.f32.mrb[14].mxu0 }
 0x5fd   : > { %v1595_v34 = vsel %vm905_vm6, %v1590_v31, -inf  ;;  %v2087_v35 = vpop.f32.mrb[15].mxu0 }
 0x5fe   : > { %v1596_v36 = vrot.slane %v1595_v34, 4 }
 0x600   : > { %v1597_v37 = vmax.f32 %v1595_v34, %v1596_v36 }
 0x602   : > { %v1598_v38 = vrot.slane %v1597_v37, 2 }
 0x604   : > { %v1599_v39 = vmax.f32 %v1597_v37, %v1598_v38 }
 0x606   : > { %v1600_v40 = vrot.slane %v1599_v39, 1 }
 0x608   : > { %v1601_v41 = vmax.f32 %v1599_v39, %v1600_v40 }
 0x60a   : > { %v1602_v42 = vsub.f32 %v1590_v31, %v1601_v41 }
 0x60c   : > { %v1603_v43 = vmul.f32 1.442695, %v1602_v42 }
 0x60e   : > { %2256 = vpow2.f32 %v1603_v43 }
 0x618   : > { %v2257_v44 = vpop.eup %2256 }
 0x619   : > { %v1605_v45 = vsel %vm905_vm6, %v2257_v44, 0.0 }
 0x61a   : > { %v1606_v46 = vrot.slane %v1605_v45, 4 }
 0x61c   : > { %v1607_v47 = vadd.f32 %v1606_v46, %v1605_v45 }
 0x61e   : > { %v1608_v48 = vrot.slane %v1607_v47, 2 }
 0x620   : > { %v1609_v49 = vadd.f32 %v1608_v48, %v1607_v47 }
 0x622   : > { %v1610_v50 = vrot.slane %v1609_v49, 1 }
 0x624   : > { %v1611_v51 = vadd.f32 %v1610_v50, %v1609_v49 }
 0x626   : > { %2258 = vrcp.f32 %v1611_v51 }
 0x630   : > { %v2259_v54 = vpop.eup %2258 }
 0x631   : > { %v1613_v55 = vmul.f32 %v2259_v54, %v2257_v44 }
 0x633   : > { %1615 = vrot.lane.b32.xlu0 %v1613_v55, %s2937_s1 }
 0x6a5   : > { %v1616_v62 = vpop.permute.xlu0 %1615 }
 0x6a6   : > { %v1618_v63 = vmul.f32 %v1616_v62, %v1590_v31 }
 0x6a8   : > { %1627 = vrot.lane.b32.xlu0 %v1618_v63, %s2938_s20  ;;  %1622 = vrot.lane.b32.xlu1 %v1618_v63, %s2936_s21  ;;  %1620 = vst.msk [vmem:[#allocation9] sm:$0x1] %vm1619_vm1, %v1618_v63  ;;  %s1999_s21 = sshll.u32 %s2442_s17, 4  ;;  %s1845_s17 = scalar_lea.sflag [#allocation11], %s458_s25 }
 0x6a9   : > { %s2860_s18 = scalar_lea.hbm %s2916_s14, %s1999_s21 }
 0x6ac   : > { %1632 = vrot.lane.b32.xlu1 %v1618_v63, %s2937_s1  ;;  %s459_s1 = scalar_lea.vmem [#allocation10], %s458_s25 }
 0x6ad   : > { %s1857_s20 = sshll.u32 %s459_s1, 4  ;;  %s2862_s20 = int_to_ptr.vmem [resolvable:$true] %s1857_s20 }
 0x6ae   : > { %s2266_s28 = scalar_lea.vmem %s2862_s20, 16  ;;  %p2273_p0 = scmp.lt.s32.totalorder %s2862_s20, %s2271_s26 }
 0x6af   : > { %p2267_p11 = scmp.ne.s32.totalorder %s2862_s20, %s2266_s28  ;;  %p2274_p1 = scmp.lt.s32.totalorder %s2272_s0, %s2266_s28 }
 0x6b1   : > { %p2268_p12 = pnand %p2267_p11, %p2459_p5  ;;  %p2275_p2 = por %p2274_p1, %p2273_p0 }
 0x6b3   : > { %p2269_p13 = pneg %p2268_p12 }
 0x6b5   : > { %p2276_p3 = pnand %p2275_p2, %p2269_p13 }
 0x71a   : > { %v1628_v0 = vpop.permute.xlu0 %1627  ;;  %v1623_v1 = vpop.permute.xlu1 %1622 }
 0x71b   : > { %1626 = vst.msk [vmem:[#allocation9 - $0x1] sm:$0x2] %vm1625_vm13, %v1623_v1 }
 0x71c   : > { %1631 = vst.msk [vmem:[#allocation9 - $0x2] sm:$0x4] %vm1630_vm14, %v1628_v0 }
 0x71e   : > { %v1633_v2 = vpop.permute.xlu1 %1632 }
 0x71f   : > { %1636 = vst.msk [vmem:[#allocation9 - $0x3] sm:$0x8] %vm1635_vm15, %v1633_v2 }
 0x726   : > { %v1637_v3 = vld [vmem:[#allocation9] sm:$0x1] }
 0x727   : > { %v1638_v5 = vpack.c.bf16 %v1637_v3, %v1637_v3 }
 0x729   : > { %2105 = vmatmul.mubr.bf16.vlgmr.msra.gmra.mrb[8].mxu1 %v1638_v5 }
 0x7fc   : > { %v1738_v7 = vpop.f32.mrb[8].mxu1 }
 0x7fd   : > { %v1739_v8 = vadd.f32 %v1738_v7, %v1655_v6  ;;  %v2106_v9 = vpop.f32.mrb[9].mxu1 }
 0x7fe   : > { %v1741_v10 = vpop.f32.mrb[10].mxu1 }
 0x7ff   : > { %v2107_v11 = vpop.f32.mrb[11].mxu1  ;;  %v1745_v12 = vsel %vm1744_vm0, %v1739_v8, 0.0 }
 0x800   : > { %1746 = vadd.xlane.f32.xlu0 %v1745_v12 }
 0x88d   : > { %v1747_v14 = vpop.xlane.xlu0 %1746 }
 0x88e   : > { %v1749_v13 = vmul.f32 0.015625, %v1747_v14 }
 0x890   : > { %v1750_v16 = vsub.f32 %v1739_v8, %v1749_v13 }
 0x892   : > { %v1751_v17 = vmul.f32 %v1750_v16, %v1750_v16 }
 0x894   : > { %v1752_v18 = vsel %vm1744_vm0, %v1751_v17, 0.0 }
 0x895   : > { %1753 = vadd.xlane.f32.xlu1 %v1752_v18 }
 0x922   : > { %v1754_v22 = vpop.xlane.xlu1 %1753 }
 0x923   : > { %v1755_v23 = vmul.f32 0.015625, %v1754_v22 }
 0x925   : > { %v1756_v24 = vadd.f32 1e-05, %v1755_v23 }
 0x927   : > { %2260 = vrsqrt.f32 %v1756_v24 }
 0x931   : > { %v2261_v25 = vpop.eup %2260 }
 0x932   : > { %v1758_v26 = vmul.f32 %v2261_v25, %v1750_v16 }
 0x934   : > { %v1993_v27 = vmul.f32 -1.442695, %v1758_v26 }
 0x936   : > { %2262 = vpow2.f32 %v1993_v27 }
 0x940   : > { %v2263_v28 = vpop.eup %2262 }
 0x941   : > { %v1762_v29 = vadd.f32 1.0, %v2263_v28 }
 0x943   : > { %2264 = vrcp.f32 %v1762_v29 }
 0x94d   : > { %v2265_v30 = vpop.eup %2264 }
 0x94e   : > { %v1765_v31 = vpack.c.bf16 %v2265_v30, %v2265_v30 }
 0x950   : > { %2117 = vmatmul.mubr.msk.bf16.vlgmr.msra.gmra.mrb[16].mxu0 %vm1551_vm12, %v1765_v31 }
 0xa23   : > { %v1836_v32 = vpop.f32.mrb[16].mxu0 }
 0xa24   : > { %v1837_v33 = vadd.f32 %v1836_v32, %v1774_v4  ;;  %v2118_v34 = vpop.f32.mrb[17].mxu0 }
 0xa25   : > { %v1839_v35 = vpop.f32.mrb[18].mxu0 }
 0xa26   : > { %v2119_v36 = vpop.f32.mrb[19].mxu0  ;;  %1843 = vst.msk [vmem:[%s459_s1] sm:$0x1] %vm1842_vm2, %v1837_v33 }
 0xa27   : > { %2279 = shalt.err (!%p2276_p3)
}
 0xa28   : > { %s2280_s25 = scalar_lea.hbm %s2860_s18, 16  ;;  %s2284_s2 = scalar_lea.hbm %s2916_s14, 32 }
 0xa29   : > { %p2281_p4 = scmp.ne.s32.totalorder %s2860_s18, %s2280_s25  ;;  %p2285_p9 = scmp.lt.u32.totalorder %s2860_s18, %s2916_s14 }
 0xa2a   : > { %p2286_p10 = scmp.lt.u32.totalorder %s2284_s2, %s2280_s25  ;;  %p2288_p12 = scmp.lt.u32.totalorder %s2280_s25, %s2860_s18 }
 0xa2b   : > { %p2282_p7 = pnand %p2281_p4, %p2459_p5 }
 0xa2c   : > { %p2287_p11 = por %p2286_p10, %p2285_p9 }
 0xa2d   : > { %p2283_p8 = pneg %p2282_p7 }
 0xa2e   : > { %p2289_p13 = por %p2288_p12, %p2287_p11 }
 0xa30   : > { %p2290_p0 = pnand %p2289_p13, %p2283_p8 }
 0xa32   : > { %2293 = shalt.err (!%p2290_p0)
}
 0xa33   : > { %2121 = dma.vmem_to_hbm [thread:$0]  (%p2459_p5), %s2862_s20, 16, %s2860_s18, %s1845_s17  }
 0xa34 PF: > { %p2127_p1 = scmp.ge.s32.totalorder %s2328_s16, 2  ;;  %s1869_s28 = sand.u32 1, %s2316_s29  }
 0xa35   : > { %s1870_s26 = scalar_lea.sflag [#allocation11], %s1869_s28 }
 0xa36   : > { %p2124_p2 = pnand %p2127_p1, %p2463_p6 }
 0xa38   : > { %2311 = dma.done.wait (!%p2124_p2), %s1870_s26, 16  }
 0xa39   : > { %2313 = vsyncadd (!%p2124_p2), %s1870_s26, 4294967280  ;;  %p24_p3 = scmp.ge.s32.totalorder %s2446_s19, 4   ;;  %s2939_s29 = smov %s2320_s30 }
 0xa3a   : > { %s2940_s30 = smov %s2324_s15  ;;  %s2941_s15 = smov %s2457_s22 }
 0xa3b   : > { %s2942_s16 = smov %s2446_s19  ;;  %26 = sbr.rel (!%p24_p3) target bundleno = 8 (0x8), region = 113 }
 0xa42   :  { %1874 = vsyncpa [#allocation11], 1 }
 0xa43   :  { %1876 = vsyncpa [#allocation11 + $0x1], 1 }

</bundles_post_ra>
